<compile_context>
chip_gen: v7x
topology: tpu7x:2x2x1
jax: 0.10.0
libtpu: 0.0.40
codegen_flags: <defaults>
</compile_context>

<pallas_src>
import functools

import jax
import jax.numpy as jnp
from jax import lax
from jax.experimental import pallas as pl
from jax.experimental.pallas import tpu as pltpu

LANE = 128
SUBLANE = 8


def _round_up(x, m):
    return ((x + m - 1) // m) * m


def _pad_to(x, shape):
    return jnp.pad(x, [(0, t - s) for s, t in zip(x.shape, shape)])


# ----------------------------------------------------------------------------
# Pallas kernel (one molecule per grid step)
# ----------------------------------------------------------------------------
def _mpn_kernel(num_steps,
                edge_in_ref, eh0_ref, nf_ref, prop_ref, scat_to_ref,
                w12_w_ref, b123_ref, w3_w_ref,
                u1_w_ref, u1_b_ref, u2_w_ref, u2_b_ref,
                node_h_ref, edge_h_ref):
    # Loop-invariant per-edge term:  [x_from | e_feat] @ [W1; W2] + (b1 + b2 + b3).
    base = (jnp.dot(edge_in_ref[...], w12_w_ref[...],
                    preferred_element_type=jnp.float32)
            + b123_ref[...])

    prop = prop_ref[...]   # fused gather/scatter/backlink operator   [E_p, E_p]
    w3 = w3_w_ref[...]     # [De_p, De_p]

    def step(_, eh):
        msg = jnp.dot(prop, eh, preferred_element_type=jnp.float32)          # [E_p, De_p]
        return jnp.maximum(
            base + jnp.dot(msg, w3, preferred_element_type=jnp.float32), 0.0)

    eh = lax.fori_loop(0, num_steps, step, eh0_ref[...], unroll=True)

    # Node readout: relu(U1(x) + scatter_add_to(U2(eh))).
    u1_x = (jnp.dot(nf_ref[...], u1_w_ref[...], preferred_element_type=jnp.float32)
            + u1_b_ref[...])
    u2_eh = (jnp.dot(eh, u2_w_ref[...], preferred_element_type=jnp.float32)
             + u2_b_ref[...])
    node_sum = jnp.dot(scat_to_ref[...], u2_eh, preferred_element_type=jnp.float32)

    node_h_ref[...] = jnp.maximum(u1_x + node_sum, 0.0)
    edge_h_ref[...] = eh


# ----------------------------------------------------------------------------
# Wrapper: padding, fused operator construction, pallas_call
# ----------------------------------------------------------------------------
@functools.partial(jax.jit, static_argnums=(6,))
def encode_mol_mpn(node_features, edge_features, edge_hiddens, from_nodes, to_nodes,
                   params, num_steps):
    B, N, Fn = node_features.shape
    _, E, Fe = edge_features.shape
    De = edge_hiddens.shape[-1]
    Dn = params["U1_w"].shape[1]

    # Lane-dense / sublane-aligned padded sizes (zero padding is exact here).
    N_p = _round_up(N, SUBLANE)
    E_p = _round_up(E, LANE)         # E is the lane axis of prop / scatter_to
    Fn_p = _round_up(Fn, LANE)
    F12_p = _round_up(Fn + Fe, LANE)
    De_p = _round_up(De, LANE)
    Dn_p = _round_up(Dn, LANE)

    batch_ix = jnp.arange(B)[:, None]
    # Index-based gather of the from-node features (no dense [E,N] one-hot), then
    # concatenate with the edge features so the W1/W2 linears fuse into one matmul.
    nf_u = node_features[batch_ix, from_nodes]                                  # [B, E, Fn]
    edge_in = jnp.concatenate([nf_u, edge_features], axis=-1)                   # [B, E, Fn+Fe]

    # Fused loop-invariant propagation operator:
    #   prop[e, e'] = [from[e'] == from[e]] - [e' == backlink(e)]
    same_from = (from_nodes[:, :, None] == from_nodes[:, None, :]).astype(jnp.float32)
    idx = jnp.arange(E)
    backlink_idx = idx + (idx + 1) % 2 * 2 - 1                                  # swap (2k, 2k+1)
    backlink = jax.nn.one_hot(backlink_idx, E, dtype=jnp.float32)               # [E, E]
    prop = same_from - backlink[None]                                           # [B, E, E]

    # Scatter-add over to_nodes for the node readout.
    scat_to = jnp.swapaxes(jax.nn.one_hot(to_nodes, N, dtype=jnp.float32), 1, 2)  # [B, N, E]

    edge_in_p = _pad_to(edge_in, (B, E_p, F12_p))
    eh0_p = _pad_to(edge_hiddens, (B, E_p, De_p))
    nf_p = _pad_to(node_features, (B, N_p, Fn_p))
    prop_p = _pad_to(prop, (B, E_p, E_p))
    scat_p = _pad_to(scat_to, (B, N_p, E_p))

    # Stacked W1/W2 weight and folded bias (constant plumbing, done once).
    w12_w = _pad_to(jnp.concatenate([params["W1_w"], params["W2_w"]], axis=0),
                    (F12_p, De_p))
    b123 = _pad_to(params["W1_b"] + params["W2_b"] + params["W3_b"], (1, De_p))
    w3_w = _pad_to(params["W3_w"], (De_p, De_p))
    u1_w = _pad_to(params["U1_w"], (Fn_p, Dn_p)); u1_b = _pad_to(params["U1_b"], (1, Dn_p))
    u2_w = _pad_to(params["U2_w"], (De_p, Dn_p)); u2_b = _pad_to(params["U2_b"], (1, Dn_p))

    per_mol = lambda shape: pl.BlockSpec((None,) + shape, lambda b: (b, 0, 0))
    shared = lambda shape: pl.BlockSpec(shape, lambda b: (0,) * len(shape))

    in_specs = [
        per_mol((E_p, F12_p)),   # [gathered from-node feats | edge feats]
        per_mol((E_p, De_p)),    # initial edge hiddens
        per_mol((N_p, Fn_p)),    # node features
        per_mol((E_p, E_p)),     # fused propagation operator
        per_mol((N_p, E_p)),     # scatter_to
        shared((F12_p, De_p)), shared((1, De_p)),   # [W1;W2], b1+b2+b3
        shared((De_p, De_p)),                        # W3
        shared((Fn_p, Dn_p)), shared((1, Dn_p)),     # U1
        shared((De_p, Dn_p)), shared((1, Dn_p)),     # U2
    ]
    out_specs = (per_mol((N_p, Dn_p)), per_mol((E_p, De_p)))

    node_h_p, edge_h_p = pl.pallas_call(
        functools.partial(_mpn_kernel, num_steps),
        grid=(B,),
        in_specs=in_specs,
        out_specs=out_specs,
        out_shape=(jax.ShapeDtypeStruct((B, N_p, Dn_p), jnp.float32),
                   jax.ShapeDtypeStruct((B, E_p, De_p), jnp.float32)),
        compiler_params=pltpu.CompilerParams(
            dimension_semantics=("parallel",)),
    )(edge_in_p, eh0_p, nf_p, prop_p, scat_p,
      w12_w, b123, w3_w, u1_w, u1_b, u2_w, u2_b)

    return node_h_p[:, :N, :Dn], edge_h_p[:, :E, :De]


# ----------------------------------------------------------------------------
# Pure-JAX reference (mirrors the PyTorch forward exactly; single molecule)
# ----------------------------------------------------------------------------
def reference(node_features, edge_features, edge_hiddens, from_nodes, to_nodes,
              params, num_steps):
    N = node_features.shape[0]
    E = edge_features.shape[0]
    De = edge_hiddens.shape[1]
    Dn = params["U1_w"].shape[1]

    w1_x_u = (node_features @ params["W1_w"] + params["W1_b"])[from_nodes]
    w2_x_uv = edge_features @ params["W2_w"] + params["W2_b"]
    idx = jnp.arange(E)
    backlink = idx + (idx + 1) % 2 * 2 - 1

    eh = edge_hiddens
    for _ in range(num_steps):
        s = jnp.zeros((N, De), jnp.float32).at[from_nodes].add(eh)
        wu = s[from_nodes] - eh[backlink]
        eh = jax.nn.relu(w1_x_u + w2_x_uv + wu @ params["W3_w"] + params["W3_b"])

    u1 = node_features @ params["U1_w"] + params["U1_b"]
    u2 = eh @ params["U2_w"] + params["U2_b"]
    ns = jnp.zeros((N, Dn), jnp.float32).at[to_nodes].add(u2)
    return jax.nn.relu(u1 + ns), eh


# ----------------------------------------------------------------------------
# Deterministic parameter init (PyTorch nn.Linear-style uniform bounds)
# ----------------------------------------------------------------------------
def _linear_params(key, fan_in, fan_out):
    kw, kb = jax.random.split(key)
    bound = 1.0 / (fan_in ** 0.5)
    w = jax.random.uniform(kw, (fan_in, fan_out), jnp.float32, -bound, bound)
    b = jax.random.uniform(kb, (1, fan_out), jnp.float32, -bound, bound)
    return w, b


if __name__ == "__main__":
    num_steps = 4
    B = 2                  # molecules per pallas_call (parallel grid axis)
    N = 16                 # num_nodes
    num_pairs = 12
    E = 2 * num_pairs      # num_edges (consecutive u->v, v->u pairs)
    Fn = 32                # node_features_dim
    Fe = 16                # edge_features_dim
    Dn = 32                # node_hidden_dim
    De = 32                # edge_hidden_dim

    key = jax.random.PRNGKey(0)
    k_nf, k_ef, k_eh, k1, k2, k3, k4, k5 = jax.random.split(key, 8)

    node_features = jax.random.normal(k_nf, (B, N, Fn), jnp.float32)
    edge_features = jax.random.normal(k_ef, (B, E, Fe), jnp.float32)
    edge_hiddens = jax.random.normal(k_eh, (B, E, De), jnp.float32)

    # Molecule 0: chain over nodes 0..num_pairs; molecule 1: ring over 0..num_pairs-1.
    chain_from = [v for k in range(num_pairs) for v in (k, k + 1)]
    chain_to = [v for k in range(num_pairs) for v in (k + 1, k)]
    ring_from = [v for k in range(num_pairs) for v in (k, (k + 1) % num_pairs)]
    ring_to = [v for k in range(num_pairs) for v in ((k + 1) % num_pairs, k)]
    from_nodes = jnp.array([chain_from, ring_from], dtype=jnp.int32)
    to_nodes = jnp.array([chain_to, ring_to], dtype=jnp.int32)

    w1_w, w1_b = _linear_params(k1, Fn, De)
    w2_w, w2_b = _linear_params(k2, Fe, De)
    w3_w, w3_b = _linear_params(k3, De, De)
    u1_w, u1_b = _linear_params(k4, Fn, Dn)
    u2_w, u2_b = _linear_params(k5, De, Dn)
    params = dict(W1_w=w1_w, W1_b=w1_b, W2_w=w2_w, W2_b=w2_b,
                  W3_w=w3_w, W3_b=w3_b, U1_w=u1_w, U1_b=u1_b,
                  U2_w=u2_w, U2_b=u2_b)

    node_h, edge_h = encode_mol_mpn(node_features, edge_features, edge_hiddens,
                                    from_nodes, to_nodes, params, num_steps)
    jax.block_until_ready((node_h, edge_h))

    assert node_h.shape == (B, N, Dn) and edge_h.shape == (B, E, De)
    for b in range(B):
        nh_ref, eh_ref = reference(node_features[b], edge_features[b], edge_hiddens[b],
                                   from_nodes[b], to_nodes[b], params, num_steps)
        assert jnp.allclose(node_h[b], nh_ref, atol=1e-4, rtol=1e-4)
        assert jnp.allclose(edge_h[b], eh_ref, atol=1e-4, rtol=1e-4)
    print("KERNEL_OK")
</pallas_src>

<mosaic_0001>
module attributes {stable_mosaic.version = 11 : i64} {
  func.func @_mpn_kernel(%arg0: i32, %arg1: memref<1x128x128xf32, #tpu.memory_space<vmem>>, %arg2: memref<1x128x128xf32, #tpu.memory_space<vmem>>, %arg3: memref<1x16x128xf32, #tpu.memory_space<vmem>>, %arg4: memref<1x128x128xf32, #tpu.memory_space<vmem>>, %arg5: memref<1x16x128xf32, #tpu.memory_space<vmem>>, %arg6: memref<128x128xf32, #tpu.memory_space<vmem>>, %arg7: memref<1x128xf32, #tpu.memory_space<vmem>>, %arg8: memref<128x128xf32, #tpu.memory_space<vmem>>, %arg9: memref<128x128xf32, #tpu.memory_space<vmem>>, %arg10: memref<1x128xf32, #tpu.memory_space<vmem>>, %arg11: memref<128x128xf32, #tpu.memory_space<vmem>>, %arg12: memref<1x128xf32, #tpu.memory_space<vmem>>, %arg13: memref<1x16x128xf32, #tpu.memory_space<vmem>>, %arg14: memref<1x128x128xf32, #tpu.memory_space<vmem>>) attributes {dimension_semantics = [#tpu.dimension_semantics<parallel>], iteration_bounds = array<i64: 2>, scalar_prefetch = 0 : i64, scratch_operands = 0 : i64, tpu.core_type = #tpu.core_type<tc>, window_params = [{transform_indices = @transform_0, window_bounds = array<i64: 1, 128, 128>}, {transform_indices = @transform_1, window_bounds = array<i64: 1, 128, 128>}, {transform_indices = @transform_2, window_bounds = array<i64: 1, 16, 128>}, {transform_indices = @transform_3, window_bounds = array<i64: 1, 128, 128>}, {transform_indices = @transform_4, window_bounds = array<i64: 1, 16, 128>}, {pipeline_mode = #tpu.pipeline_mode<synchronous>, transform_indices = @transform_5, window_bounds = array<i64: 128, 128>}, {pipeline_mode = #tpu.pipeline_mode<synchronous>, transform_indices = @transform_6, window_bounds = array<i64: 1, 128>}, {pipeline_mode = #tpu.pipeline_mode<synchronous>, transform_indices = @transform_7, window_bounds = array<i64: 128, 128>}, {pipeline_mode = #tpu.pipeline_mode<synchronous>, transform_indices = @transform_8, window_bounds = array<i64: 128, 128>}, {pipeline_mode = #tpu.pipeline_mode<synchronous>, transform_indices = @transform_9, window_bounds = array<i64: 1, 128>}, {pipeline_mode = #tpu.pipeline_mode<synchronous>, transform_indices = @transform_10, window_bounds = array<i64: 128, 128>}, {pipeline_mode = #tpu.pipeline_mode<synchronous>, transform_indices = @transform_11, window_bounds = array<i64: 1, 128>}, {transform_indices = @transform_12, window_bounds = array<i64: 1, 16, 128>}, {transform_indices = @transform_13, window_bounds = array<i64: 1, 128, 128>}]} {
    %c0 = arith.constant 0 : index
    %c0_0 = arith.constant 0 : index
    %c0_1 = arith.constant 0 : index
    %0 = vector.load %arg1[%c0, %c0_0, %c0_1] : memref<1x128x128xf32, #tpu.memory_space<vmem>>, vector<1x128x128xf32>
    %1 = vector.shape_cast %0 : vector<1x128x128xf32> to vector<128x128xf32>
    %c0_2 = arith.constant 0 : index
    %c0_3 = arith.constant 0 : index
    %2 = vector.load %arg6[%c0_2, %c0_3] : memref<128x128xf32, #tpu.memory_space<vmem>>, vector<128x128xf32>
    %cst = arith.constant dense<0.000000e+00> : vector<128x128xf32>
    %3 = tpu.matmul %1, %2, %cst {dimension_numbers = #tpu.dot_dimension_numbers<[1], [0], [0], [1], [0, 0, 1, 1], [], []>} : vector<128x128xf32>, vector<128x128xf32>, vector<128x128xf32> -> vector<128x128xf32>
    %c0_4 = arith.constant 0 : index
    %c0_5 = arith.constant 0 : index
    %4 = vector.load %arg7[%c0_4, %c0_5] : memref<1x128xf32, #tpu.memory_space<vmem>>, vector<1x128xf32>
    %5 = vector.broadcast %4 : vector<1x128xf32> to vector<128x128xf32>
    %6 = arith.addf %3, %5 : vector<128x128xf32>
    %c0_6 = arith.constant 0 : index
    %c0_7 = arith.constant 0 : index
    %c0_8 = arith.constant 0 : index
    %7 = vector.load %arg4[%c0_6, %c0_7, %c0_8] : memref<1x128x128xf32, #tpu.memory_space<vmem>>, vector<1x128x128xf32>
    %8 = vector.shape_cast %7 : vector<1x128x128xf32> to vector<128x128xf32>
    %c0_9 = arith.constant 0 : index
    %c0_10 = arith.constant 0 : index
    %9 = vector.load %arg8[%c0_9, %c0_10] : memref<128x128xf32, #tpu.memory_space<vmem>>, vector<128x128xf32>
    %c0_11 = arith.constant 0 : index
    %c0_12 = arith.constant 0 : index
    %c0_13 = arith.constant 0 : index
    %10 = vector.load %arg2[%c0_11, %c0_12, %c0_13] : memref<1x128x128xf32, #tpu.memory_space<vmem>>, vector<1x128x128xf32>
    %11 = vector.shape_cast %10 : vector<1x128x128xf32> to vector<128x128xf32>
    %c0_i32 = arith.constant 0 : i32
    %cst_14 = arith.constant dense<0.000000e+00> : vector<128x128xf32>
    %12 = tpu.matmul %8, %11, %cst_14 {dimension_numbers = #tpu.dot_dimension_numbers<[1], [0], [0], [1], [0, 0, 1, 1], [], []>} : vector<128x128xf32>, vector<128x128xf32>, vector<128x128xf32> -> vector<128x128xf32>
    %cst_15 = arith.constant dense<0.000000e+00> : vector<128x128xf32>
    %13 = tpu.matmul %12, %9, %cst_15 {dimension_numbers = #tpu.dot_dimension_numbers<[1], [0], [0], [1], [0, 0, 1, 1], [], []>} : vector<128x128xf32>, vector<128x128xf32>, vector<128x128xf32> -> vector<128x128xf32>
    %14 = arith.addf %6, %13 : vector<128x128xf32>
    %cst_16 = arith.constant 0.000000e+00 : f32
    %15 = vector.broadcast %cst_16 : f32 to vector<128x128xf32>
    %16 = arith.maximumf %14, %15 : vector<128x128xf32>
    %c1_i32 = arith.constant 1 : i32
    %cst_17 = arith.constant dense<0.000000e+00> : vector<128x128xf32>
    %17 = tpu.matmul %8, %16, %cst_17 {dimension_numbers = #tpu.dot_dimension_numbers<[1], [0], [0], [1], [0, 0, 1, 1], [], []>} : vector<128x128xf32>, vector<128x128xf32>, vector<128x128xf32> -> vector<128x128xf32>
    %cst_18 = arith.constant dense<0.000000e+00> : vector<128x128xf32>
    %18 = tpu.matmul %17, %9, %cst_18 {dimension_numbers = #tpu.dot_dimension_numbers<[1], [0], [0], [1], [0, 0, 1, 1], [], []>} : vector<128x128xf32>, vector<128x128xf32>, vector<128x128xf32> -> vector<128x128xf32>
    %19 = arith.addf %6, %18 : vector<128x128xf32>
    %cst_19 = arith.constant 0.000000e+00 : f32
    %20 = vector.broadcast %cst_19 : f32 to vector<128x128xf32>
    %21 = arith.maximumf %19, %20 : vector<128x128xf32>
    %c2_i32 = arith.constant 2 : i32
    %cst_20 = arith.constant dense<0.000000e+00> : vector<128x128xf32>
    %22 = tpu.matmul %8, %21, %cst_20 {dimension_numbers = #tpu.dot_dimension_numbers<[1], [0], [0], [1], [0, 0, 1, 1], [], []>} : vector<128x128xf32>, vector<128x128xf32>, vector<128x128xf32> -> vector<128x128xf32>
    %cst_21 = arith.constant dense<0.000000e+00> : vector<128x128xf32>
    %23 = tpu.matmul %22, %9, %cst_21 {dimension_numbers = #tpu.dot_dimension_numbers<[1], [0], [0], [1], [0, 0, 1, 1], [], []>} : vector<128x128xf32>, vector<128x128xf32>, vector<128x128xf32> -> vector<128x128xf32>
    %24 = arith.addf %6, %23 : vector<128x128xf32>
    %cst_22 = arith.constant 0.000000e+00 : f32
    %25 = vector.broadcast %cst_22 : f32 to vector<128x128xf32>
    %26 = arith.maximumf %24, %25 : vector<128x128xf32>
    %c3_i32 = arith.constant 3 : i32
    %cst_23 = arith.constant dense<0.000000e+00> : vector<128x128xf32>
    %27 = tpu.matmul %8, %26, %cst_23 {dimension_numbers = #tpu.dot_dimension_numbers<[1], [0], [0], [1], [0, 0, 1, 1], [], []>} : vector<128x128xf32>, vector<128x128xf32>, vector<128x128xf32> -> vector<128x128xf32>
    %cst_24 = arith.constant dense<0.000000e+00> : vector<128x128xf32>
    %28 = tpu.matmul %27, %9, %cst_24 {dimension_numbers = #tpu.dot_dimension_numbers<[1], [0], [0], [1], [0, 0, 1, 1], [], []>} : vector<128x128xf32>, vector<128x128xf32>, vector<128x128xf32> -> vector<128x128xf32>
    %29 = arith.addf %6, %28 : vector<128x128xf32>
    %cst_25 = arith.constant 0.000000e+00 : f32
    %30 = vector.broadcast %cst_25 : f32 to vector<128x128xf32>
    %31 = arith.maximumf %29, %30 : vector<128x128xf32>
    %c0_26 = arith.constant 0 : index
    %c0_27 = arith.constant 0 : index
    %c0_28 = arith.constant 0 : index
    %32 = vector.load %arg3[%c0_26, %c0_27, %c0_28] : memref<1x16x128xf32, #tpu.memory_space<vmem>>, vector<1x16x128xf32>
    %33 = vector.shape_cast %32 : vector<1x16x128xf32> to vector<16x128xf32>
    %c0_29 = arith.constant 0 : index
    %c0_30 = arith.constant 0 : index
    %34 = vector.load %arg9[%c0_29, %c0_30] : memref<128x128xf32, #tpu.memory_space<vmem>>, vector<128x128xf32>
    %cst_31 = arith.constant dense<0.000000e+00> : vector<16x128xf32>
    %35 = tpu.matmul %33, %34, %cst_31 {dimension_numbers = #tpu.dot_dimension_numbers<[1], [0], [0], [1], [0, 0, 1, 1], [], []>} : vector<16x128xf32>, vector<128x128xf32>, vector<16x128xf32> -> vector<16x128xf32>
    %c0_32 = arith.constant 0 : index
    %c0_33 = arith.constant 0 : index
    %36 = vector.load %arg10[%c0_32, %c0_33] : memref<1x128xf32, #tpu.memory_space<vmem>>, vector<1x128xf32>
    %37 = vector.broadcast %36 : vector<1x128xf32> to vector<16x128xf32>
    %38 = arith.addf %35, %37 : vector<16x128xf32>
    %c0_34 = arith.constant 0 : index
    %c0_35 = arith.constant 0 : index
    %39 = vector.load %arg11[%c0_34, %c0_35] : memref<128x128xf32, #tpu.memory_space<vmem>>, vector<128x128xf32>
    %cst_36 = arith.constant dense<0.000000e+00> : vector<128x128xf32>
    %40 = tpu.matmul %31, %39, %cst_36 {dimension_numbers = #tpu.dot_dimension_numbers<[1], [0], [0], [1], [0, 0, 1, 1], [], []>} : vector<128x128xf32>, vector<128x128xf32>, vector<128x128xf32> -> vector<128x128xf32>
    %c0_37 = arith.constant 0 : index
    %c0_38 = arith.constant 0 : index
    %41 = vector.load %arg12[%c0_37, %c0_38] : memref<1x128xf32, #tpu.memory_space<vmem>>, vector<1x128xf32>
    %42 = vector.broadcast %41 : vector<1x128xf32> to vector<128x128xf32>
    %43 = arith.addf %40, %42 : vector<128x128xf32>
    %c0_39 = arith.constant 0 : index
    %c0_40 = arith.constant 0 : index
    %c0_41 = arith.constant 0 : index
    %44 = vector.load %arg5[%c0_39, %c0_40, %c0_41] : memref<1x16x128xf32, #tpu.memory_space<vmem>>, vector<1x16x128xf32>
    %45 = vector.shape_cast %44 : vector<1x16x128xf32> to vector<16x128xf32>
    %cst_42 = arith.constant dense<0.000000e+00> : vector<16x128xf32>
    %46 = tpu.matmul %45, %43, %cst_42 {dimension_numbers = #tpu.dot_dimension_numbers<[1], [0], [0], [1], [0, 0, 1, 1], [], []>} : vector<16x128xf32>, vector<128x128xf32>, vector<16x128xf32> -> vector<16x128xf32>
    %47 = arith.addf %38, %46 : vector<16x128xf32>
    %cst_43 = arith.constant 0.000000e+00 : f32
    %48 = vector.broadcast %cst_43 : f32 to vector<16x128xf32>
    %49 = arith.maximumf %47, %48 : vector<16x128xf32>
    %c0_44 = arith.constant 0 : index
    %c0_45 = arith.constant 0 : index
    %c0_46 = arith.constant 0 : index
    %50 = vector.load %arg13[%c0_44, %c0_45, %c0_46] : memref<1x16x128xf32, #tpu.memory_space<vmem>>, vector<1x16x128xf32>
    %51 = vector.shape_cast %50 : vector<1x16x128xf32> to vector<16x128xf32>
    %52 = vector.shape_cast %49 : vector<16x128xf32> to vector<1x16x128xf32>
    tpu.vector_store %arg13[%c0_44, %c0_45, %c0_46], %52 {strides = array<i32>} : memref<1x16x128xf32, #tpu.memory_space<vmem>>, vector<1x16x128xf32>,
    %c0_47 = arith.constant 0 : index
    %c0_48 = arith.constant 0 : index
    %c0_49 = arith.constant 0 : index
    %53 = vector.load %arg14[%c0_47, %c0_48, %c0_49] : memref<1x128x128xf32, #tpu.memory_space<vmem>>, vector<1x128x128xf32>
    %54 = vector.shape_cast %53 : vector<1x128x128xf32> to vector<128x128xf32>
    %55 = vector.shape_cast %31 : vector<128x128xf32> to vector<1x128x128xf32>
    tpu.vector_store %arg14[%c0_47, %c0_48, %c0_49], %55 {strides = array<i32>} : memref<1x128x128xf32, #tpu.memory_space<vmem>>, vector<1x128x128xf32>,
    return
  }
  func.func @transform_0(%arg0: i32) -> (i32, i32, i32) {
    %c0_i32 = arith.constant 0 : i32
    %c0_i32_0 = arith.constant 0 : i32
    %c0_i32_1 = arith.constant 0 : i32
    return %arg0, %c0_i32, %c0_i32_0 : i32, i32, i32
  }
  func.func @transform_1(%arg0: i32) -> (i32, i32, i32) {
    %c0_i32 = arith.constant 0 : i32
    %c0_i32_0 = arith.constant 0 : i32
    %c0_i32_1 = arith.constant 0 : i32
    return %arg0, %c0_i32, %c0_i32_0 : i32, i32, i32
  }
  func.func @transform_2(%arg0: i32) -> (i32, i32, i32) {
    %c0_i32 = arith.constant 0 : i32
    %c0_i32_0 = arith.constant 0 : i32
    %c0_i32_1 = arith.constant 0 : i32
    return %arg0, %c0_i32, %c0_i32_0 : i32, i32, i32
  }
  func.func @transform_3(%arg0: i32) -> (i32, i32, i32) {
    %c0_i32 = arith.constant 0 : i32
    %c0_i32_0 = arith.constant 0 : i32
    %c0_i32_1 = arith.constant 0 : i32
    return %arg0, %c0_i32, %c0_i32_0 : i32, i32, i32
  }
  func.func @transform_4(%arg0: i32) -> (i32, i32, i32) {
    %c0_i32 = arith.constant 0 : i32
    %c0_i32_0 = arith.constant 0 : i32
    %c0_i32_1 = arith.constant 0 : i32
    return %arg0, %c0_i32, %c0_i32_0 : i32, i32, i32
  }
  func.func @transform_5(%arg0: i32) -> (i32, i32) {
    %c0_i32 = arith.constant 0 : i32
    %c0_i32_0 = arith.constant 0 : i32
    %c0_i32_1 = arith.constant 0 : i32
    return %c0_i32, %c0_i32_0 : i32, i32
  }
  func.func @transform_6(%arg0: i32) -> (i32, i32) {
    %c0_i32 = arith.constant 0 : i32
    %c0_i32_0 = arith.constant 0 : i32
    %c0_i32_1 = arith.constant 0 : i32
    return %c0_i32, %c0_i32_0 : i32, i32
  }
  func.func @transform_7(%arg0: i32) -> (i32, i32) {
    %c0_i32 = arith.constant 0 : i32
    %c0_i32_0 = arith.constant 0 : i32
    %c0_i32_1 = arith.constant 0 : i32
    return %c0_i32, %c0_i32_0 : i32, i32
  }
  func.func @transform_8(%arg0: i32) -> (i32, i32) {
    %c0_i32 = arith.constant 0 : i32
    %c0_i32_0 = arith.constant 0 : i32
    %c0_i32_1 = arith.constant 0 : i32
    return %c0_i32, %c0_i32_0 : i32, i32
  }
  func.func @transform_9(%arg0: i32) -> (i32, i32) {
    %c0_i32 = arith.constant 0 : i32
    %c0_i32_0 = arith.constant 0 : i32
    %c0_i32_1 = arith.constant 0 : i32
    return %c0_i32, %c0_i32_0 : i32, i32
  }
  func.func @transform_10(%arg0: i32) -> (i32, i32) {
    %c0_i32 = arith.constant 0 : i32
    %c0_i32_0 = arith.constant 0 : i32
    %c0_i32_1 = arith.constant 0 : i32
    return %c0_i32, %c0_i32_0 : i32, i32
  }
  func.func @transform_11(%arg0: i32) -> (i32, i32) {
    %c0_i32 = arith.constant 0 : i32
    %c0_i32_0 = arith.constant 0 : i32
    %c0_i32_1 = arith.constant 0 : i32
    return %c0_i32, %c0_i32_0 : i32, i32
  }
  func.func @transform_12(%arg0: i32) -> (i32, i32, i32) {
    %c0_i32 = arith.constant 0 : i32
    %c0_i32_0 = arith.constant 0 : i32
    %c0_i32_1 = arith.constant 0 : i32
    return %arg0, %c0_i32, %c0_i32_0 : i32, i32, i32
  }
  func.func @transform_13(%arg0: i32) -> (i32, i32, i32) {
    %c0_i32 = arith.constant 0 : i32
    %c0_i32_0 = arith.constant 0 : i32
    %c0_i32_1 = arith.constant 0 : i32
    return %arg0, %c0_i32, %c0_i32_0 : i32, i32, i32
  }
}

</mosaic_0001>

<bundles_post_ra>
// kernel: encode_mol_mpn.1
= control target key start
LH: loop header
LB: loop body
LE: loop exit
PB: predicated region body
PF: predicated region fallthrough
CT: control target
= control target key end

     0   :  { %s4903_s0 = inlined_call_operand.vmem [shape: f32[2,128,128], index: 0, kind: input, shape index: {}]   ;;  %s4904_s1 = inlined_call_operand.vmem [shape: f32[2,128,128], index: 1, kind: input, shape index: {}]   ;;  %s4905_s2 = inlined_call_operand.vmem [shape: f32[2,16,128], index: 2, kind: input, shape index: {}]   ;;  %s4906_s3 = inlined_call_operand.vmem [shape: f32[2,128,128], index: 3, kind: input, shape index: {}]   ;;  %s4907_s4 = inlined_call_operand.vmem [shape: f32[2,16,128], index: 4, kind: input, shape index: {}]   ;;  %s4908_s5 = inlined_call_operand.vmem [shape: f32[128,128], index: 5, kind: input, shape index: {}]   ;;  %s4909_s6 = inlined_call_operand.vmem [shape: f32[1,128], index: 6, kind: input, shape index: {}]   ;;  %s4910_s7 = inlined_call_operand.vmem [shape: f32[128,128], index: 7, kind: input, shape index: {}]   ;;  %s4911_s8 = inlined_call_operand.vmem [shape: f32[128,128], index: 8, kind: input, shape index: {}]   ;;  %s4912_s9 = inlined_call_operand.vmem [shape: f32[1,128], index: 9, kind: input, shape index: {}]   ;;  %s4913_s10 = inlined_call_operand.vmem [shape: f32[128,128], index: 10, kind: input, shape index: {}]   ;;  %s4914_s11 = inlined_call_operand.vmem [shape: f32[1,128], index: 11, kind: input, shape index: {}]   ;;  %s4915_s12 = inlined_call_operand.hbm [shape: f32[2,16,128], index: 12, kind: output, shape index: {0}]   ;;  %s4916_s13 = inlined_call_operand.vmem [shape: f32[2,128,128], index: 13, kind: output, shape index: {1}]  }
   0x1   :  { %4918 = sst [smem:[#allocation7_spill]] %s4903_s0 }
   0x2   :  { %4919 = sst [smem:[#allocation8_spill]] %s4904_s1 }
   0x3   :  { %19 = vsyncpa [#allocation3], 0 }
   0x4   :  { %21 = vsyncpa [#allocation3 + $0x1], 0  ;;  %s4160_s25 = smov 0   ;;  %s4162_s26 = smov 0  }
   0x5   :  { %s4164_s27 = smov 0   ;;  %s4166_s28 = smov 0  }
   0x6 LB: > { %4920 = sst [smem:[#allocation5_spill]] %s4081_s27  ;;  %s4181_s29 = sadd.s32 4294967295, %s4085_s28   ;;  %s4085_s28 = sphi %s4166_s28, %s4930_s28   ;;  %s4081_s27 = sphi %s4164_s27, %s4927_s27   ;;  %s4077_s26 = sphi %s4162_s26, %s4929_s26   ;;  %s4073_s25 = sphi %s4160_s25, %s4928_s25  }
   0x7   : > { %s2576_s30 = sadd.s32 4294967294, %s4085_s28   ;;  %s4185_s14 = sadd.s32 1, %s4085_s28  }
   0x8   : > { %s311_s15 = sadd.s32 1, %s4081_s27  ;;  %s308_s16 = ssub.s32 %s4085_s28, %s4185_s14 }
   0x9   : > { %p321_p0 = scmp.ne.s32.totalorder %s4081_s27, %s4077_s26  ;;  %p309_p1 = scmp.eq.s32.totalorder %s308_s16, 0 }
   0xa   : > { %p322_p2 = scmp.eq.s32.totalorder %s4181_s29, 1  ;;  %p327_p3 = scmp.ne.s32.totalorder %s4077_s26, %s4073_s25 }
   0xb   : > { %p328_p4 = scmp.eq.s32.totalorder %s2576_s30, 1  ;;  %p2579_p7 = scmp.ge.s32.totalorder %s4085_s28, 1 }
   0xc   : > { %s4196_s17 = scalar_select %p309_p1, %s4081_s27, %s311_s15  }
   0xd   : > { %p4198_p5 = por %p322_p2, %p321_p0  ;;  %p4202_p6 = por %p328_p4, %p327_p3 }
   0xe   : > { %4921 = sst [smem:[#allocation6_spill]] %s4196_s17  ;;  %p433_p8 = scmp.lt.s32.totalorder %s4085_s28, 3 }
  0x10   : > { %p434_p9 = pnand %p2579_p7, %p433_p8 }
  0x11   : > { %p502_p10 = scmp.lt.s32.totalorder (!%p434_p9), %s4181_s29, 1  ;;  %v548_v0 = vld [vmem:[%s4908_s5] sm:$0xff] (!%p434_p9)  ;;  %v549_v1 = vld [vmem:[%s4908_s5 + $0x8] sm:$0xff] (!%p434_p9)  ;;  %v550_v2 = vld [vmem:[%s4908_s5 + $0x10] sm:$0xff] (!%p434_p9)  ;;  %s4924_s1 = sld [smem:[#allocation8_spill]] (!%p434_p9) }
  0x12   : > { %437 = sbr.rel (%p434_p9) target bundleno = 2372 (0x944), region = 68  ;;  %v3594_v3 = vpack.c.bf16 (!%p434_p9), %v549_v1, %v548_v0  ;;  %v551_v4 = vld [vmem:[%s4908_s5 + $0x18] sm:$0xff] (!%p434_p9)  ;;  %v552_v6 = vld [vmem:[%s4908_s5 + $0x20] sm:$0xff] (!%p434_p9)  ;;  %v553_v7 = vld [vmem:[%s4908_s5 + $0x28] sm:$0xff] (!%p434_p9)  ;;  %s4925_s0 = sld [smem:[#allocation7_spill]] (!%p434_p9) }
  0x13   : > { %v3598_v5 = vpack.c.bf16 (!%p434_p9), %v551_v4, %v550_v2  ;;  %v3602_v8 = vpack.c.bf16 (!%p434_p9), %v553_v7, %v552_v6  ;;  %v554_v9 = vld [vmem:[%s4908_s5 + $0x30] sm:$0xff] (!%p434_p9)  ;;  %v555_v10 = vld [vmem:[%s4908_s5 + $0x38] sm:$0xff] (!%p434_p9)  ;;  %v556_v20 = vld [vmem:[%s4908_s5 + $0x40] sm:$0xff] (!%p434_p9)  ;;  %s4087_s21 = smov (!%p434_p9), [#allocation2]  }
  0x14   : > { %3595 = vmatprep.subr.bf16.mxu0 (!%p434_p9), %v3594_v3  ;;  %v3606_v19 = vpack.c.bf16 (!%p434_p9), %v555_v10, %v554_v9  ;;  %v557_v21 = vld [vmem:[%s4908_s5 + $0x48] sm:$0xff] (!%p434_p9)  ;;  %v558_v27 = vld [vmem:[%s4908_s5 + $0x50] sm:$0xff] (!%p434_p9)  ;;  %v559_v28 = vld [vmem:[%s4908_s5 + $0x58] sm:$0xff] (!%p434_p9) }
  0x15   : > { %3597 = vmatpush3.bf16.msra.mxu0 (!%p434_p9), %v3594_v3  ;;  %v3610_v26 = vpack.c.bf16 (!%p434_p9), %v557_v21, %v556_v20  ;;  %v3614_v33 = vpack.c.bf16 (!%p434_p9), %v559_v28, %v558_v27  ;;  %v560_v34 = vld [vmem:[%s4908_s5 + $0x60] sm:$0xff] (!%p434_p9)  ;;  %v561_v35 = vld [vmem:[%s4908_s5 + $0x68] sm:$0xff] (!%p434_p9)  ;;  %v562_v40 = vld [vmem:[%s4908_s5 + $0x70] sm:$0xff] (!%p434_p9) }
  0x16   : > { %3599 = vmatprep.subr.bf16.mxu0 (!%p434_p9), %v3598_v5  ;;  %v3618_v39 = vpack.c.bf16 (!%p434_p9), %v561_v35, %v560_v34  ;;  %v563_v41 = vld [vmem:[%s4908_s5 + $0x78] sm:$0xff] (!%p434_p9)  ;;  %v732_v46 = vld [vmem:[%s4910_s7] sm:$0xff] (!%p434_p9)  ;;  %v733_v47 = vld [vmem:[%s4910_s7 + $0x8] sm:$0xff] (!%p434_p9) }
  0x17   : > { %v3622_v45 = vpack.c.bf16 (!%p434_p9), %v563_v41, %v562_v40  ;;  %v4308_v51 = vpack.c.bf16 (!%p434_p9), %v733_v47, %v732_v46  ;;  %v734_v52 = vld [vmem:[%s4910_s7 + $0x10] sm:$0xff] (!%p434_p9)  ;;  %v735_v53 = vld [vmem:[%s4910_s7 + $0x18] sm:$0xff] (!%p434_p9)  ;;  %v736_v58 = vld [vmem:[%s4910_s7 + $0x20] sm:$0xff] (!%p434_p9) }
  0x18   : > { %v4319_v57 = vpack.c.bf16 (!%p434_p9), %v735_v53, %v734_v52  ;;  %v737_v59 = vld [vmem:[%s4910_s7 + $0x28] sm:$0xff] (!%p434_p9)  ;;  %v738_v0 = vld [vmem:[%s4910_s7 + $0x30] sm:$0xff] (!%p434_p9)  ;;  %v739_v1 = vld [vmem:[%s4910_s7 + $0x38] sm:$0xff] (!%p434_p9) }
  0x19   : > { %s4222_s17 = scalar_select %p502_p10, %s4181_s29, 1  ;;  %3601 = vmatpush3.bf16.msra.mxu0 %v3598_v5  ;;  %v4331_v62 = vpack.c.bf16 %v737_v59, %v736_v58  ;;  %v4350_v5 = vpack.c.bf16 %v739_v1, %v738_v0  ;;  %v740_v7 = vld [vmem:[%s4910_s7 + $0x40] sm:$0xff] }
  0x1a   : > { %3603 = vmatprep.subr.bf16.mxu0 %v3602_v8  ;;  %v744_v21 = vld [vmem:[%s4910_s7 + $0x60] sm:$0xff] }
  0x1b   : > { %s4231_s23 = sshll.u32 %s4222_s17, 7 }
  0x1c   : > { %s4237_s15 = scalar_lea.vmem %s4924_s1, %s4231_s23  ;;  %s4255_s30 = scalar_lea.vmem %s4906_s3, %s4231_s23 }
  0x1d   : > { %v748_v11 = vld [vmem:[%s4237_s15] sm:$0xff]  ;;  %v749_v12 = vld [vmem:[%s4237_s15 + $0x8] sm:$0xff]  ;;  %v750_v13 = vld [vmem:[%s4237_s15 + $0x10] sm:$0xff]  ;;  %3605 = vmatpush3.bf16.msra.mxu0 %v3602_v8  ;;  %s4273_s27 = scalar_lea.vmem %s4925_s0, %s4231_s23  ;;  %s4797_s20 = scalar_lea.vmem %s4916_s13, %s4231_s23 }
  0x1e   : > { %v3626_v14 = vpack.c.bf16 %v749_v12, %v748_v11  ;;  %v751_v15 = vld [vmem:[%s4237_s15 + $0x18] sm:$0xff]  ;;  %v752_v17 = vld [vmem:[%s4237_s15 + $0x20] sm:$0xff]  ;;  %v753_v18 = vld [vmem:[%s4237_s15 + $0x28] sm:$0xff]  ;;  %3607 = vmatprep.subr.bf16.mxu0 %v3606_v19 }
  0x1f   : > { %v3630_v16 = vpack.c.bf16 %v751_v15, %v750_v13  ;;  %v3634_v22 = vpack.c.bf16 %v753_v18, %v752_v17  ;;  %v4264_v23 = vld [vmem:[%s4255_s30] sm:$0xff]  ;;  %v754_v24 = vld [vmem:[%s4237_s15 + $0x30] sm:$0xff]  ;;  %v755_v25 = vld [vmem:[%s4237_s15 + $0x38] sm:$0xff] }
  0x20   : > { %3627 = vmatprep.subr.bf16.mxu1 %v3626_v14  ;;  %3052 = vmatprep.mubr.f32.mxu1 %v4264_v23  ;;  %v3638_v29 = vpack.c.bf16 %v755_v25, %v754_v24  ;;  %v756_v30 = vld [vmem:[%s4237_s15 + $0x40] sm:$0xff]  ;;  %v757_v31 = vld [vmem:[%s4237_s15 + $0x48] sm:$0xff]  ;;  %v758_v37 = vld [vmem:[%s4237_s15 + $0x50] sm:$0xff] }
  0x21   : > { %3629 = vmatpush3.bf16.msra.mxu1 %v3626_v14  ;;  %3609 = vmatpush3.bf16.msra.mxu0 %v3606_v19  ;;  %v532_v32 = vld [vmem:[%s4273_s27] sm:$0xff]  ;;  %v3642_v36 = vpack.c.bf16 %v757_v31, %v756_v30  ;;  %v759_v38 = vld [vmem:[%s4237_s15 + $0x58] sm:$0xff]  ;;  %v761_v44 = vld [vmem:[%s4237_s15 + $0x68] sm:$0xff] }
  0x22   : > { %3631 = vmatprep.subr.bf16.mxu1 %v3630_v16  ;;  %3611 = vmatprep.subr.bf16.mxu0 %v3610_v26  ;;  %v3646_v42 = vpack.c.bf16 %v759_v38, %v758_v37  ;;  %v760_v43 = vld [vmem:[%s4237_s15 + $0x60] sm:$0xff]  ;;  %v762_v49 = vld [vmem:[%s4237_s15 + $0x70] sm:$0xff]  ;;  %v763_v50 = vld [vmem:[%s4237_s15 + $0x78] sm:$0xff] }
  0x23   : > { %2996 = vmatprep.mubr.f32.mxu0 %v532_v32  ;;  %v3650_v48 = vpack.c.bf16 %v761_v44, %v760_v43  ;;  %v3654_v54 = vpack.c.bf16 %v763_v50, %v762_v49  ;;  %v533_v55 = vld [vmem:[%s4273_s27 + $0x8] sm:$0xff]  ;;  %v534_v56 = vld [vmem:[%s4273_s27 + $0x10] sm:$0xff]  ;;  %v535_v60 = vld [vmem:[%s4273_s27 + $0x18] sm:$0xff] }
  0x24   : > { %v536_v61 = vld [vmem:[%s4273_s27 + $0x20] sm:$0xff]  ;;  %v4334_v63 = vld [vmem:[%s4255_s30 + $0x8] sm:$0xff]  ;;  %v4343_v2 = vld [vmem:[%s4255_s30 + $0x10] sm:$0xff] }
  0x25   : > { %3633 = vmatpush3.bf16.msra.mxu1 %v3630_v16  ;;  %3613 = vmatpush3.bf16.msra.mxu0 %v3610_v26  ;;  %v537_v3 = vld [vmem:[%s4273_s27 + $0x28] sm:$0xff]  ;;  %v538_v4 = vld [vmem:[%s4273_s27 + $0x30] sm:$0xff]  ;;  %v4354_v6 = vld [vmem:[%s4255_s30 + $0x18] sm:$0xff] }
  0x26   : > { %3635 = vmatprep.subr.bf16.mxu1 %v3634_v22  ;;  %3615 = vmatprep.subr.bf16.mxu0 %v3614_v33  ;;  %v741_v8 = vld [vmem:[%s4910_s7 + $0x48] sm:$0xff]  ;;  %v4363_v9 = vld [vmem:[%s4255_s30 + $0x20] sm:$0xff]  ;;  %v539_v10 = vld [vmem:[%s4273_s27 + $0x38] sm:$0xff] }
  0x27   : > { %v540_v11 = vld [vmem:[%s4273_s27 + $0x40] sm:$0xff]  ;;  %v4370_v12 = vpack.c.bf16 %v741_v8, %v740_v7  ;;  %v4374_v13 = vld [vmem:[%s4255_s30 + $0x28] sm:$0xff]  ;;  %v742_v14 = vld [vmem:[%s4910_s7 + $0x50] sm:$0xff] }
  0x28   : > { %v743_v15 = vld [vmem:[%s4910_s7 + $0x58] sm:$0xff]  ;;  %v4383_v16 = vld [vmem:[%s4255_s30 + $0x30] sm:$0xff]  ;;  %v541_v17 = vld [vmem:[%s4273_s27 + $0x48] sm:$0xff] }
  0x29   : > { %3637 = vmatpush3.bf16.msra.mxu1 %v3634_v22  ;;  %3617 = vmatpush3.bf16.msra.mxu0 %v3614_v33  ;;  %v542_v18 = vld [vmem:[%s4273_s27 + $0x50] sm:$0xff]  ;;  %v4390_v19 = vpack.c.bf16 %v743_v15, %v742_v14  ;;  %v4394_v20 = vld [vmem:[%s4255_s30 + $0x38] sm:$0xff]  ;;  %v745_v22 = vld [vmem:[%s4910_s7 + $0x68] sm:$0xff] }
  0x2a   : > { %3639 = vmatprep.subr.bf16.mxu1 %v3638_v29  ;;  %3619 = vmatprep.subr.bf16.mxu0 %v3618_v39  ;;  %v4403_v24 = vld [vmem:[%s4255_s30 + $0x40] sm:$0xff]  ;;  %v543_v25 = vld [vmem:[%s4273_s27 + $0x58] sm:$0xff]  ;;  %v4410_v27 = vpack.c.bf16 %v745_v22, %v744_v21  ;;  %v4414_v28 = vld [vmem:[%s4255_s30 + $0x48] sm:$0xff] }
  0x2b   : > { %v544_v26 = vld [vmem:[%s4273_s27 + $0x60] sm:$0xff]  ;;  %v747_v30 = vld [vmem:[%s4910_s7 + $0x78] sm:$0xff]  ;;  %v4423_v31 = vld [vmem:[%s4255_s30 + $0x50] sm:$0xff] }
  0x2c   : > { %v545_v32 = vld [vmem:[%s4273_s27 + $0x68] sm:$0xff]  ;;  %v546_v33 = vld [vmem:[%s4273_s27 + $0x70] sm:$0xff]  ;;  %v4434_v35 = vld [vmem:[%s4255_s30 + $0x58] sm:$0xff] }
  0x2d   : > { %3641 = vmatpush3.bf16.msra.mxu1 %v3638_v29  ;;  %3621 = vmatpush3.bf16.msra.mxu0 %v3618_v39  ;;  %v746_v29 = vld [vmem:[%s4910_s7 + $0x70] sm:$0xff]  ;;  %v547_v37 = vld [vmem:[%s4273_s27 + $0x78] sm:$0xff]  ;;  %v4445_v38 = vld [vmem:[%s4255_s30 + $0x68] sm:$0xff]  ;;  %s2603_s27 = sshll.u32 %s4222_s17, 4  ;;  %s492_s17 = sand.u32 1, %s4077_s26  }
  0x2e   : > { %3643 = vmatprep.subr.bf16.mxu1 %v3642_v36  ;;  %3623 = vmatprep.subr.bf16.mxu0 %v3622_v45  ;;  %v4430_v34 = vpack.c.bf16 %v747_v30, %v746_v29  ;;  %v4448_v39 = vld [vmem:[%s4255_s30 + $0x70] sm:$0xff]  ;;  %v4455_v40 = vld [vmem:[%s4255_s30 + $0x78] sm:$0xff]  ;;  %v4510_v22 = vld [vmem:[%s4909_s6] ss:$0 sm:$0xff]  ;;  %s516_s1 = scalar_lea.vmem %s4905_s2, %s2603_s27  ;;  %s2580_s0 = sshll.u32 %s492_s17, 4 }
  0x2f   : > { %s494_s22 = scalar_lea.vmem [#allocation2], %s2580_s0  ;;  %s4862_s23 = scalar_lea.sflag [#allocation3], %s492_s17 }
  0x30   : > { %s2438_s24 = sshll.u32 %s494_s22, 4  ;;  %s4027_s0 = sshll.u32 %s4087_s21, 4  ;;  %s4855_s24 = int_to_ptr.vmem [resolvable:$true] %s2438_s24  ;;  %s4028_s0 = int_to_ptr.vmem [resolvable:$false] %s4027_s0 }
  0x31   : > { %3645 = vmatpush3.bf16.msra.mxu1 %v3642_v36  ;;  %3625 = vmatpush3.bf16.msra.mxu0 %v3622_v45  ;;  %v4437_v36 = vld [vmem:[%s4255_s30 + $0x60] sm:$0xff]  ;;  %s4029_s30 = scalar_lea.vmem %s4028_s0, 512  ;;  %p4030_p0 = scmp.lt.s32.totalorder %s4855_s24, %s4028_s0 }
  0x32   : > { %3647 = vmatprep.subr.bf16.mxu1 %v3646_v42  ;;  %3659 = vmatprep.subr.bf16.mxu0 %v4308_v51 }
  0x34   : > { %2997 = vmatmul.mubr.f32.vlgmr.msra.gmra.mrb[0].mxu0 %v533_v55 }
  0x35   : > { %3649 = vmatpush3.bf16.msra.mxu1 %v3646_v42  ;;  %3661 = vmatpush3.bf16.msra.mxu0 %v4308_v51 }
  0x36   : > { %3651 = vmatprep.subr.bf16.mxu1 %v3650_v48  ;;  %2999 = vmatprep.mubr.f32.mxu0 %v534_v56 }
  0x37   : > { %3663 = vmatprep.subr.bf16.mxu0 %v4319_v57 }
  0x38   : > { %3000 = vmatmul.mubr.f32.gmra.mrb[2].mxu0 %v535_v60 }
  0x39   : > { %3653 = vmatpush3.bf16.msra.mxu1 %v3650_v48  ;;  %3665 = vmatpush3.bf16.msra.mxu0 %v4319_v57 }
  0x3a   : > { %3655 = vmatprep.subr.bf16.mxu1 %v3654_v54  ;;  %3002 = vmatprep.mubr.f32.mxu0 %v536_v61 }
  0x3b   : > { %3667 = vmatprep.subr.bf16.mxu0 %v4331_v62 }
  0x3c   : > { %3003 = vmatmul.mubr.f32.gmra.mrb[4].mxu0 %v537_v3 }
  0x3d   : > { %3657 = vmatpush3.bf16.msra.mxu1 %v3654_v54  ;;  %3669 = vmatpush3.bf16.msra.mxu0 %v4331_v62 }
  0x3e   : > { %3005 = vmatprep.mubr.f32.mxu0 %v538_v4  ;;  %3671 = vmatprep.subr.bf16.mxu0 %v4350_v5 }
  0x40   : > { %3053 = vmatmul.mubr.f32.vlgmr.msra.gmra.mrb[0].mxu1 %v4334_v63  ;;  %3006 = vmatmul.mubr.f32.gmra.mrb[6].mxu0 %v539_v10 }
  0x41   : > { %3055 = vmatprep.mubr.f32.mxu1 %v4343_v2  ;;  %3673 = vmatpush3.bf16.msra.mxu0 %v4350_v5 }
  0x42   : > { %3008 = vmatprep.mubr.f32.mxu0 %v540_v11  ;;  %3675 = vmatprep.subr.bf16.mxu0 %v4370_v12 }
  0x44   : > { %3056 = vmatmul.mubr.f32.gmra.mrb[2].mxu1 %v4354_v6  ;;  %3009 = vmatmul.mubr.f32.gmra.mrb[8].mxu0 %v541_v17 }
  0x45   : > { %3058 = vmatprep.mubr.f32.mxu1 %v4363_v9  ;;  %3677 = vmatpush3.bf16.msra.mxu0 %v4370_v12 }
  0x46   : > { %3011 = vmatprep.mubr.f32.mxu0 %v542_v18  ;;  %3679 = vmatprep.subr.bf16.mxu0 %v4390_v19 }
  0x48   : > { %3059 = vmatmul.mubr.f32.gmra.mrb[4].mxu1 %v4374_v13  ;;  %3012 = vmatmul.mubr.f32.gmra.mrb[10].mxu0 %v543_v25 }
  0x49   : > { %3061 = vmatprep.mubr.f32.mxu1 %v4383_v16  ;;  %3681 = vmatpush3.bf16.msra.mxu0 %v4390_v19 }
  0x4a   : > { %3014 = vmatprep.mubr.f32.mxu0 %v544_v26  ;;  %3683 = vmatprep.subr.bf16.mxu0 %v4410_v27 }
  0x4c   : > { %3062 = vmatmul.mubr.f32.gmra.mrb[6].mxu1 %v4394_v20  ;;  %3015 = vmatmul.mubr.f32.gmra.mrb[12].mxu0 %v545_v32 }
  0x4d   : > { %3064 = vmatprep.mubr.f32.mxu1 %v4403_v24  ;;  %3685 = vmatpush3.bf16.msra.mxu0 %v4410_v27 }
  0x4e   : > { %3017 = vmatprep.mubr.f32.mxu0 %v546_v33  ;;  %3687 = vmatprep.subr.bf16.mxu0 %v4430_v34 }
  0x50   : > { %3065 = vmatmul.mubr.f32.gmra.mrb[8].mxu1 %v4414_v28  ;;  %3018 = vmatmul.mubr.f32.gmra.mrb[14].mxu0 %v547_v37 }
  0x51   : > { %3067 = vmatprep.mubr.f32.mxu1 %v4423_v31  ;;  %3689 = vmatpush3.bf16.msra.mxu0 %v4430_v34 }
  0x52   : > { %3723 = vmatprep.subr.bf16.mxu0 %v4308_v51 }
  0x54   : > { %3068 = vmatmul.mubr.f32.gmra.mrb[10].mxu1 %v4434_v35 }
  0x55   : > { %3070 = vmatprep.mubr.f32.mxu1 %v4437_v36 }
  0x58   : > { %3071 = vmatmul.mubr.f32.gmra.mrb[12].mxu1 %v4445_v38 }
  0x59   : > { %3073 = vmatprep.mubr.f32.mxu1 %v4448_v39 }
  0x5c   : > { %3074 = vmatmul.mubr.f32.gmra.mrb[14].mxu1 %v4455_v40 }
  0x5d   : > { %3164 = vmatprep.mubr.f32.mxu1 %v4264_v23 }
 0x107   : > { %v4459_v41 = vpop.f32.mrb[0].mxu0 }
 0x108   : > { %v4461_v42 = vpop.f32.mrb[1].mxu0  ;;  %v4514_v25 = vadd.f32 %v4459_v41, %v4510_v22 }
 0x109   : > { %v4518_v26 = vadd.f32 %v4510_v22, %v4461_v42 }
 0x10b   : > { %v4463_v43 = vpop.f32.mrb[2].mxu0 }
 0x10c   : > { %v4465_v44 = vpop.f32.mrb[3].mxu0  ;;  %v4524_v37 = vadd.f32 %v4463_v43, %v4510_v22 }
 0x10f   : > { %v4467_v47 = vpop.f32.mrb[4].mxu0 }
 0x110   : > { %v4469_v48 = vpop.f32.mrb[5].mxu0 }
 0x111   : > { %v4538_v43 = vadd.f32 %v4510_v22, %v4469_v48 }
 0x113   : > { %v3054_v45 = vpop.f32.mrb[0].mxu1  ;;  %v4473_v52 = vpop.f32.mrb[6].mxu0 }
 0x114   : > { %v830_v46 = vpop.f32.mrb[1].mxu1  ;;  %v4475_v53 = vpop.f32.mrb[7].mxu0 }
 0x115   : > { %3108 = vmatprep.mubr.f32.mxu0 %v830_v46  ;;  %v4528_v46 = vadd.f32 %v4510_v22, %v4465_v44 }
 0x116   : > { %3109 = vmatmul.mubr.f32.vlgmr.msra.gmra.mrb[16].mxu0 %v3054_v45 }
 0x117   : > { %v3057_v49 = vpop.f32.mrb[2].mxu1  ;;  %3725 = vmatpush3.bf16.msra.mxu0 %v4308_v51  ;;  %v4479_v56 = vpop.f32.mrb[8].mxu0 }
 0x118   : > { %v840_v50 = vpop.f32.mrb[3].mxu1  ;;  %3727 = vmatprep.subr.bf16.mxu0 %v4319_v57  ;;  %v4481_v58 = vpop.f32.mrb[9].mxu0 }
 0x119   : > { %3111 = vmatprep.mubr.f32.mxu0 %v840_v50 }
 0x11a   : > { %3112 = vmatmul.mubr.f32.gmra.mrb[18].mxu0 %v3057_v49 }
 0x11b   : > { %v3060_v54 = vpop.f32.mrb[4].mxu1  ;;  %3729 = vmatpush3.bf16.msra.mxu0 %v4319_v57  ;;  %v4485_v61 = vpop.f32.mrb[10].mxu0 }
 0x11c   : > { %v850_v55 = vpop.f32.mrb[5].mxu1  ;;  %3731 = vmatprep.subr.bf16.mxu0 %v4331_v62  ;;  %v4487_v0 = vpop.f32.mrb[11].mxu0 }
 0x11d   : > { %3114 = vmatprep.mubr.f32.mxu0 %v850_v55 }
 0x11e   : > { %3115 = vmatmul.mubr.f32.gmra.mrb[20].mxu0 %v3060_v54 }
 0x11f   : > { %v3063_v59 = vpop.f32.mrb[6].mxu1  ;;  %3733 = vmatpush3.bf16.msra.mxu0 %v4331_v62  ;;  %v4491_v4 = vpop.f32.mrb[12].mxu0 }
 0x120   : > { %v860_v60 = vpop.f32.mrb[7].mxu1  ;;  %3735 = vmatprep.subr.bf16.mxu0 %v4350_v5  ;;  %v4493_v7 = vpop.f32.mrb[13].mxu0 }
 0x121   : > { %3117 = vmatprep.mubr.f32.mxu0 %v860_v60 }
 0x122   : > { %3118 = vmatmul.mubr.f32.gmra.mrb[22].mxu0 %v3063_v59  ;;  %v4534_v59 = vadd.f32 %v4467_v47, %v4510_v22 }
 0x123   : > { %v3066_v1 = vpop.f32.mrb[8].mxu1  ;;  %3737 = vmatpush3.bf16.msra.mxu0 %v4350_v5  ;;  %v4497_v11 = vpop.f32.mrb[14].mxu0 }
 0x124   : > { %v870_v3 = vpop.f32.mrb[9].mxu1  ;;  %3739 = vmatprep.subr.bf16.mxu0 %v4370_v12  ;;  %v4499_v14 = vpop.f32.mrb[15].mxu0 }
 0x125   : > { %3120 = vmatprep.mubr.f32.mxu0 %v870_v3 }
 0x126   : > { %3121 = vmatmul.mubr.f32.gmra.mrb[24].mxu0 %v3066_v1 }
 0x127   : > { %v3069_v8 = vpop.f32.mrb[10].mxu1  ;;  %3741 = vmatpush3.bf16.msra.mxu0 %v4370_v12 }
 0x128   : > { %v880_v10 = vpop.f32.mrb[11].mxu1  ;;  %3743 = vmatprep.subr.bf16.mxu0 %v4390_v19 }
 0x129   : > { %3123 = vmatprep.mubr.f32.mxu0 %v880_v10 }
 0x12a   : > { %3124 = vmatmul.mubr.f32.gmra.mrb[26].mxu0 %v3069_v8 }
 0x12b   : > { %v3072_v15 = vpop.f32.mrb[12].mxu1  ;;  %3745 = vmatpush3.bf16.msra.mxu0 %v4390_v19 }
 0x12c   : > { %v890_v17 = vpop.f32.mrb[13].mxu1  ;;  %3747 = vmatprep.subr.bf16.mxu0 %v4410_v27 }
 0x12d   : > { %3126 = vmatprep.mubr.f32.mxu0 %v890_v17  ;;  %v4544_v17 = vadd.f32 %v4473_v52, %v4510_v22 }
 0x12e   : > { %3127 = vmatmul.mubr.f32.gmra.mrb[28].mxu0 %v3072_v15 }
 0x12f   : > { %v3075_v18 = vpop.f32.mrb[14].mxu1  ;;  %3749 = vmatpush3.bf16.msra.mxu0 %v4410_v27 }
 0x130   : > { %v900_v21 = vpop.f32.mrb[15].mxu1  ;;  %3751 = vmatprep.subr.bf16.mxu0 %v4430_v34 }
 0x131   : > { %3129 = vmatprep.mubr.f32.mxu0 %v900_v21 }
 0x132   : > { %3130 = vmatmul.mubr.f32.gmra.mrb[30].mxu0 %v3075_v18  ;;  %v4548_v18 = vadd.f32 %v4510_v22, %v4475_v53 }
 0x133   : > { %3753 = vmatpush3.bf16.msra.mxu0 %v4430_v34 }
 0x134   : > { %3787 = vmatprep.subr.bf16.mxu0 %v4308_v51 }
 0x1e9   : > { %v3110_v29 = vpop.f32.mrb[16].mxu0 }
 0x1ea   : > { %v1055_v30 = vadd.f32 %v3110_v29, %v4514_v25  ;;  %v975_v32 = vpop.f32.mrb[17].mxu0 }
 0x1eb   : > { %v1054_v33 = vadd.f32 %v975_v32, %v4518_v26 }
 0x1ec   : > { %v1071_v45 = vmax.f32 %v1055_v30, 0.0 }
 0x1ed   : > { %v1070_v41 = vmax.f32 %v1054_v33, 0.0  ;;  %v3113_v49 = vpop.f32.mrb[18].mxu0 }
 0x1ee   : > { %v1057_v42 = vadd.f32 %v3113_v49, %v4524_v37  ;;  %v985_v50 = vpop.f32.mrb[19].mxu0 }
 0x1ef   : > { %v3690_v54 = vpack.c.bf16 %v1071_v45, %v1070_v41  ;;  %v1056_v55 = vadd.f32 %v985_v50, %v4528_v46  ;;  %v4554_v45 = vadd.f32 %v4479_v56, %v4510_v22  ;;  %v4558_v41 = vadd.f32 %v4510_v22, %v4481_v58 }
 0x1f0   : > { %v1073_v60 = vmax.f32 %v1057_v42, 0.0 }
 0x1f1   : > { %v1072_v1 = vmax.f32 %v1056_v55, 0.0  ;;  %v3116_v44 = vpop.f32.mrb[20].mxu0  ;;  %3691 = vmatprep.subr.bf16.mxu1 %v3690_v54 }
 0x1f2   : > { %v1059_v3 = vadd.f32 %v3116_v44, %v4534_v59  ;;  %v995_v8 = vpop.f32.mrb[21].mxu0  ;;  %3693 = vmatpush3.bf16.msra.mxu1 %v3690_v54 }
 0x1f3   : > { %v3694_v10 = vpack.c.bf16 %v1073_v60, %v1072_v1  ;;  %v1058_v15 = vadd.f32 %v995_v8, %v4538_v43  ;;  %v4564_v60 = vadd.f32 %v4485_v61, %v4510_v22  ;;  %v4568_v1 = vadd.f32 %v4510_v22, %v4487_v0 }
 0x1f4   : > { %v1075_v47 = vmax.f32 %v1059_v3, 0.0 }
 0x1f5   : > { %v1074_v48 = vmax.f32 %v1058_v15, 0.0  ;;  %v3119_v21 = vpop.f32.mrb[22].mxu0  ;;  %3695 = vmatprep.subr.bf16.mxu1 %v3694_v10 }
 0x1f6   : > { %v1061_v29 = vadd.f32 %v3119_v21, %v4544_v17  ;;  %v1005_v30 = vpop.f32.mrb[23].mxu0  ;;  %3697 = vmatpush3.bf16.msra.mxu1 %v3694_v10 }
 0x1f7   : > { %v3698_v32 = vpack.c.bf16 %v1075_v47, %v1074_v48  ;;  %v1060_v33 = vadd.f32 %v1005_v30, %v4548_v18  ;;  %v4574_v47 = vadd.f32 %v4491_v4, %v4510_v22  ;;  %v4578_v48 = vadd.f32 %v4510_v22, %v4493_v7 }
 0x1f8   : > { %v1077_v52 = vmax.f32 %v1061_v29, 0.0 }
 0x1f9   : > { %v1076_v53 = vmax.f32 %v1060_v33, 0.0  ;;  %v3122_v49 = vpop.f32.mrb[24].mxu0  ;;  %3699 = vmatprep.subr.bf16.mxu1 %v3698_v32 }
 0x1fa   : > { %v1063_v42 = vadd.f32 %v3122_v49, %v4554_v45  ;;  %v1015_v50 = vpop.f32.mrb[25].mxu0  ;;  %3701 = vmatpush3.bf16.msra.mxu1 %v3698_v32 }
 0x1fb   : > { %v3702_v54 = vpack.c.bf16 %v1077_v52, %v1076_v53  ;;  %v1062_v55 = vadd.f32 %v1015_v50, %v4558_v41  ;;  %v4584_v52 = vadd.f32 %v4497_v11, %v4510_v22  ;;  %v4588_v53 = vadd.f32 %v4510_v22, %v4499_v14 }
 0x1fc   : > { %v1079_v56 = vmax.f32 %v1063_v42, 0.0 }
 0x1fd   : > { %v1078_v58 = vmax.f32 %v1062_v55, 0.0  ;;  %v3125_v44 = vpop.f32.mrb[26].mxu0  ;;  %3703 = vmatprep.subr.bf16.mxu1 %v3702_v54 }
 0x1fe   : > { %v1065_v3 = vadd.f32 %v3125_v44, %v4564_v60  ;;  %v1025_v8 = vpop.f32.mrb[27].mxu0  ;;  %3705 = vmatpush3.bf16.msra.mxu1 %v3702_v54 }
 0x1ff   : > { %v3706_v10 = vpack.c.bf16 %v1079_v56, %v1078_v58  ;;  %v1064_v15 = vadd.f32 %v1025_v8, %v4568_v1 }
 0x200   : > { %v1081_v61 = vmax.f32 %v1065_v3, 0.0 }
 0x201   : > { %v1080_v0 = vmax.f32 %v1064_v15, 0.0  ;;  %v3128_v21 = vpop.f32.mrb[28].mxu0  ;;  %3707 = vmatprep.subr.bf16.mxu1 %v3706_v10 }
 0x202   : > { %v1067_v29 = vadd.f32 %v3128_v21, %v4574_v47  ;;  %v1035_v30 = vpop.f32.mrb[29].mxu0  ;;  %3709 = vmatpush3.bf16.msra.mxu1 %v3706_v10 }
 0x203   : > { %v3710_v32 = vpack.c.bf16 %v1081_v61, %v1080_v0  ;;  %v1066_v33 = vadd.f32 %v1035_v30, %v4578_v48 }
 0x204   : > { %v1083_v4 = vmax.f32 %v1067_v29, 0.0 }
 0x205   : > { %v1082_v7 = vmax.f32 %v1066_v33, 0.0  ;;  %v3131_v49 = vpop.f32.mrb[30].mxu0  ;;  %3711 = vmatprep.subr.bf16.mxu1 %v3710_v32 }
 0x206   : > { %v1069_v42 = vadd.f32 %v3131_v49, %v4584_v52  ;;  %v1045_v50 = vpop.f32.mrb[31].mxu0  ;;  %3713 = vmatpush3.bf16.msra.mxu1 %v3710_v32 }
 0x207   : > { %v3714_v54 = vpack.c.bf16 %v1083_v4, %v1082_v7  ;;  %v1068_v55 = vadd.f32 %v1045_v50, %v4588_v53 }
 0x208   : > { %v1085_v56 = vmax.f32 %v1069_v42, 0.0 }
 0x209   : > { %v1084_v58 = vmax.f32 %v1068_v55, 0.0  ;;  %3715 = vmatprep.subr.bf16.mxu1 %v3714_v54 }
 0x20a   : > { %3717 = vmatpush3.bf16.msra.mxu1 %v3714_v54 }
 0x20b   : > { %v3718_v11 = vpack.c.bf16 %v1085_v56, %v1084_v58 }
 0x20d   : > { %3719 = vmatprep.subr.bf16.mxu1 %v3718_v11 }
 0x20e   : > { %3721 = vmatpush3.bf16.msra.mxu1 %v3718_v11 }
 0x211   : > { %3165 = vmatmul.mubr.f32.vlgmr.msra.gmra.mrb[16].mxu1 %v4334_v63 }
 0x212   : > { %3167 = vmatprep.mubr.f32.mxu1 %v4343_v2 }
 0x215   : > { %3168 = vmatmul.mubr.f32.gmra.mrb[18].mxu1 %v4354_v6 }
 0x216   : > { %3170 = vmatprep.mubr.f32.mxu1 %v4363_v9 }
 0x219   : > { %3171 = vmatmul.mubr.f32.gmra.mrb[20].mxu1 %v4374_v13 }
 0x21a   : > { %3173 = vmatprep.mubr.f32.mxu1 %v4383_v16 }
 0x21d   : > { %3174 = vmatmul.mubr.f32.gmra.mrb[22].mxu1 %v4394_v20 }
 0x21e   : > { %3176 = vmatprep.mubr.f32.mxu1 %v4403_v24 }
 0x221   : > { %3177 = vmatmul.mubr.f32.gmra.mrb[24].mxu1 %v4414_v28 }
 0x222   : > { %3179 = vmatprep.mubr.f32.mxu1 %v4423_v31 }
 0x225   : > { %3180 = vmatmul.mubr.f32.gmra.mrb[26].mxu1 %v4434_v35 }
 0x226   : > { %3182 = vmatprep.mubr.f32.mxu1 %v4437_v36 }
 0x229   : > { %3183 = vmatmul.mubr.f32.gmra.mrb[28].mxu1 %v4445_v38 }
 0x22a   : > { %3185 = vmatprep.mubr.f32.mxu1 %v4448_v39 }
 0x22d   : > { %3186 = vmatmul.mubr.f32.gmra.mrb[30].mxu1 %v4455_v40 }
 0x22e   : > { %3276 = vmatprep.mubr.f32.mxu1 %v4264_v23 }
 0x2e4   : > { %v3166_v14 = vpop.f32.mrb[16].mxu1 }
 0x2e5   : > { %v1152_v22 = vpop.f32.mrb[17].mxu1 }
 0x2e6   : > { %3220 = vmatprep.mubr.f32.mxu0 %v1152_v22 }
 0x2e7   : > { %3221 = vmatmul.mubr.f32.vlgmr.msra.gmra.mrb[32].mxu0 %v3166_v14 }
 0x2e8   : > { %v3169_v44 = vpop.f32.mrb[18].mxu1  ;;  %3789 = vmatpush3.bf16.msra.mxu0 %v4308_v51 }
 0x2e9   : > { %v1162_v3 = vpop.f32.mrb[19].mxu1  ;;  %3791 = vmatprep.subr.bf16.mxu0 %v4319_v57 }
 0x2ea   : > { %3223 = vmatprep.mubr.f32.mxu0 %v1162_v3 }
 0x2eb   : > { %3224 = vmatmul.mubr.f32.gmra.mrb[34].mxu0 %v3169_v44 }
 0x2ec   : > { %v3172_v8 = vpop.f32.mrb[20].mxu1  ;;  %3793 = vmatpush3.bf16.msra.mxu0 %v4319_v57 }
 0x2ed   : > { %v1172_v10 = vpop.f32.mrb[21].mxu1  ;;  %3795 = vmatprep.subr.bf16.mxu0 %v4331_v62 }
 0x2ee   : > { %3226 = vmatprep.mubr.f32.mxu0 %v1172_v10 }
 0x2ef   : > { %3227 = vmatmul.mubr.f32.gmra.mrb[36].mxu0 %v3172_v8 }
 0x2f0   : > { %v3175_v15 = vpop.f32.mrb[22].mxu1  ;;  %3797 = vmatpush3.bf16.msra.mxu0 %v4331_v62 }
 0x2f1   : > { %v1182_v61 = vpop.f32.mrb[23].mxu1  ;;  %3799 = vmatprep.subr.bf16.mxu0 %v4350_v5 }
 0x2f2   : > { %3229 = vmatprep.mubr.f32.mxu0 %v1182_v61 }
 0x2f3   : > { %3230 = vmatmul.mubr.f32.gmra.mrb[38].mxu0 %v3175_v15 }
 0x2f4   : > { %v3178_v0 = vpop.f32.mrb[24].mxu1  ;;  %3801 = vmatpush3.bf16.msra.mxu0 %v4350_v5 }
 0x2f5   : > { %v1192_v21 = vpop.f32.mrb[25].mxu1  ;;  %3803 = vmatprep.subr.bf16.mxu0 %v4370_v12 }
 0x2f6   : > { %3232 = vmatprep.mubr.f32.mxu0 %v1192_v21 }
 0x2f7   : > { %3233 = vmatmul.mubr.f32.gmra.mrb[40].mxu0 %v3178_v0 }
 0x2f8   : > { %v3181_v29 = vpop.f32.mrb[26].mxu1  ;;  %3805 = vmatpush3.bf16.msra.mxu0 %v4370_v12 }
 0x2f9   : > { %v1202_v30 = vpop.f32.mrb[27].mxu1  ;;  %3807 = vmatprep.subr.bf16.mxu0 %v4390_v19 }
 0x2fa   : > { %3235 = vmatprep.mubr.f32.mxu0 %v1202_v30 }
 0x2fb   : > { %3236 = vmatmul.mubr.f32.gmra.mrb[42].mxu0 %v3181_v29 }
 0x2fc   : > { %v3184_v32 = vpop.f32.mrb[28].mxu1  ;;  %3809 = vmatpush3.bf16.msra.mxu0 %v4390_v19 }
 0x2fd   : > { %v1212_v33 = vpop.f32.mrb[29].mxu1  ;;  %3811 = vmatprep.subr.bf16.mxu0 %v4410_v27 }
 0x2fe   : > { %3238 = vmatprep.mubr.f32.mxu0 %v1212_v33 }
 0x2ff   : > { %3239 = vmatmul.mubr.f32.gmra.mrb[44].mxu0 %v3184_v32 }
 0x300   : > { %v3187_v4 = vpop.f32.mrb[30].mxu1  ;;  %3813 = vmatpush3.bf16.msra.mxu0 %v4410_v27 }
 0x301   : > { %v1222_v7 = vpop.f32.mrb[31].mxu1  ;;  %3815 = vmatprep.subr.bf16.mxu0 %v4430_v34 }
 0x302   : > { %3241 = vmatprep.mubr.f32.mxu0 %v1222_v7 }
 0x303   : > { %3242 = vmatmul.mubr.f32.gmra.mrb[46].mxu0 %v3187_v4 }
 0x304   : > { %3817 = vmatpush3.bf16.msra.mxu0 %v4430_v34 }
 0x305   : > { %3851 = vmatprep.subr.bf16.mxu0 %v4308_v51 }
 0x3ba   : > { %v3222_v49 = vpop.f32.mrb[32].mxu0 }
 0x3bb   : > { %v1377_v42 = vadd.f32 %v3222_v49, %v4514_v25  ;;  %v1297_v50 = vpop.f32.mrb[33].mxu0 }
 0x3bc   : > { %v1376_v54 = vadd.f32 %v1297_v50, %v4518_v26 }
 0x3bd   : > { %v1393_v55 = vmax.f32 %v1377_v42, 0.0 }
 0x3be   : > { %v1392_v56 = vmax.f32 %v1376_v54, 0.0  ;;  %v3225_v58 = vpop.f32.mrb[34].mxu0 }
 0x3bf   : > { %v1379_v11 = vadd.f32 %v3225_v58, %v4524_v37  ;;  %v1307_v14 = vpop.f32.mrb[35].mxu0 }
 0x3c0   : > { %v3754_v22 = vpack.c.bf16 %v1393_v55, %v1392_v56  ;;  %v1378_v44 = vadd.f32 %v1307_v14, %v4528_v46 }
 0x3c1   : > { %v1395_v3 = vmax.f32 %v1379_v11, 0.0 }
 0x3c2   : > { %v1394_v8 = vmax.f32 %v1378_v44, 0.0  ;;  %v3228_v10 = vpop.f32.mrb[36].mxu0  ;;  %3755 = vmatprep.subr.bf16.mxu1 %v3754_v22 }
 0x3c3   : > { %v1381_v15 = vadd.f32 %v3228_v10, %v4534_v59  ;;  %v1317_v61 = vpop.f32.mrb[37].mxu0  ;;  %3757 = vmatpush3.bf16.msra.mxu1 %v3754_v22 }
 0x3c4   : > { %v3758_v0 = vpack.c.bf16 %v1395_v3, %v1394_v8  ;;  %v1380_v21 = vadd.f32 %v1317_v61, %v4538_v43 }
 0x3c5   : > { %v1397_v29 = vmax.f32 %v1381_v15, 0.0 }
 0x3c6   : > { %v1396_v30 = vmax.f32 %v1380_v21, 0.0  ;;  %v3231_v32 = vpop.f32.mrb[38].mxu0  ;;  %3759 = vmatprep.subr.bf16.mxu1 %v3758_v0 }
 0x3c7   : > { %v1383_v33 = vadd.f32 %v3231_v32, %v4544_v17  ;;  %v1327_v4 = vpop.f32.mrb[39].mxu0  ;;  %3761 = vmatpush3.bf16.msra.mxu1 %v3758_v0 }
 0x3c8   : > { %v3762_v7 = vpack.c.bf16 %v1397_v29, %v1396_v30  ;;  %v1382_v49 = vadd.f32 %v1327_v4, %v4548_v18 }
 0x3c9   : > { %v1399_v42 = vmax.f32 %v1383_v33, 0.0 }
 0x3ca   : > { %v1398_v50 = vmax.f32 %v1382_v49, 0.0  ;;  %v3234_v54 = vpop.f32.mrb[40].mxu0  ;;  %3763 = vmatprep.subr.bf16.mxu1 %v3762_v7 }
 0x3cb   : > { %v1385_v55 = vadd.f32 %v3234_v54, %v4554_v45  ;;  %v1337_v56 = vpop.f32.mrb[41].mxu0  ;;  %3765 = vmatpush3.bf16.msra.mxu1 %v3762_v7 }
 0x3cc   : > { %v3766_v58 = vpack.c.bf16 %v1399_v42, %v1398_v50  ;;  %v1384_v11 = vadd.f32 %v1337_v56, %v4558_v41 }
 0x3cd   : > { %v1401_v14 = vmax.f32 %v1385_v55, 0.0 }
 0x3ce   : > { %v1400_v22 = vmax.f32 %v1384_v11, 0.0  ;;  %v3237_v44 = vpop.f32.mrb[42].mxu0  ;;  %3767 = vmatprep.subr.bf16.mxu1 %v3766_v58 }
 0x3cf   : > { %v1387_v3 = vadd.f32 %v3237_v44, %v4564_v60  ;;  %v1347_v8 = vpop.f32.mrb[43].mxu0  ;;  %3769 = vmatpush3.bf16.msra.mxu1 %v3766_v58 }
 0x3d0   : > { %v3770_v10 = vpack.c.bf16 %v1401_v14, %v1400_v22  ;;  %v1386_v15 = vadd.f32 %v1347_v8, %v4568_v1 }
 0x3d1   : > { %v1403_v61 = vmax.f32 %v1387_v3, 0.0 }
 0x3d2   : > { %v1402_v0 = vmax.f32 %v1386_v15, 0.0  ;;  %v3240_v21 = vpop.f32.mrb[44].mxu0  ;;  %3771 = vmatprep.subr.bf16.mxu1 %v3770_v10 }
 0x3d3   : > { %v1389_v29 = vadd.f32 %v3240_v21, %v4574_v47  ;;  %v1357_v30 = vpop.f32.mrb[45].mxu0  ;;  %3773 = vmatpush3.bf16.msra.mxu1 %v3770_v10 }
 0x3d4   : > { %v3774_v32 = vpack.c.bf16 %v1403_v61, %v1402_v0  ;;  %v1388_v33 = vadd.f32 %v1357_v30, %v4578_v48 }
 0x3d5   : > { %v1405_v4 = vmax.f32 %v1389_v29, 0.0 }
 0x3d6   : > { %v1404_v7 = vmax.f32 %v1388_v33, 0.0  ;;  %v3243_v49 = vpop.f32.mrb[46].mxu0  ;;  %3775 = vmatprep.subr.bf16.mxu1 %v3774_v32 }
 0x3d7   : > { %v1391_v42 = vadd.f32 %v3243_v49, %v4584_v52  ;;  %v1367_v50 = vpop.f32.mrb[47].mxu0  ;;  %3777 = vmatpush3.bf16.msra.mxu1 %v3774_v32 }
 0x3d8   : > { %v3778_v54 = vpack.c.bf16 %v1405_v4, %v1404_v7  ;;  %v1390_v55 = vadd.f32 %v1367_v50, %v4588_v53 }
 0x3d9   : > { %v1407_v56 = vmax.f32 %v1391_v42, 0.0 }
 0x3da   : > { %v1406_v58 = vmax.f32 %v1390_v55, 0.0  ;;  %3779 = vmatprep.subr.bf16.mxu1 %v3778_v54 }
 0x3db   : > { %3781 = vmatpush3.bf16.msra.mxu1 %v3778_v54 }
 0x3dc   : > { %v3782_v11 = vpack.c.bf16 %v1407_v56, %v1406_v58 }
 0x3de   : > { %3783 = vmatprep.subr.bf16.mxu1 %v3782_v11 }
 0x3df   : > { %3785 = vmatpush3.bf16.msra.mxu1 %v3782_v11 }
 0x3e2   : > { %3277 = vmatmul.mubr.f32.vlgmr.msra.gmra.mrb[32].mxu1 %v4334_v63 }
 0x3e3   : > { %3279 = vmatprep.mubr.f32.mxu1 %v4343_v2 }
 0x3e6   : > { %3280 = vmatmul.mubr.f32.gmra.mrb[34].mxu1 %v4354_v6 }
 0x3e7   : > { %3282 = vmatprep.mubr.f32.mxu1 %v4363_v9 }
 0x3ea   : > { %3283 = vmatmul.mubr.f32.gmra.mrb[36].mxu1 %v4374_v13 }
 0x3eb   : > { %3285 = vmatprep.mubr.f32.mxu1 %v4383_v16 }
 0x3ee   : > { %3286 = vmatmul.mubr.f32.gmra.mrb[38].mxu1 %v4394_v20 }
 0x3ef   : > { %3288 = vmatprep.mubr.f32.mxu1 %v4403_v24 }
 0x3f2   : > { %3289 = vmatmul.mubr.f32.gmra.mrb[40].mxu1 %v4414_v28 }
 0x3f3   : > { %3291 = vmatprep.mubr.f32.mxu1 %v4423_v31 }
 0x3f6   : > { %3292 = vmatmul.mubr.f32.gmra.mrb[42].mxu1 %v4434_v35 }
 0x3f7   : > { %3294 = vmatprep.mubr.f32.mxu1 %v4437_v36 }
 0x3fa   : > { %3295 = vmatmul.mubr.f32.gmra.mrb[44].mxu1 %v4445_v38 }
 0x3fb   : > { %3297 = vmatprep.mubr.f32.mxu1 %v4448_v39 }
 0x3fe   : > { %3298 = vmatmul.mubr.f32.gmra.mrb[46].mxu1 %v4455_v40 }
 0x3ff   : > { %3388 = vmatprep.mubr.f32.mxu1 %v4264_v23 }
 0x4b5   : > { %v3278_v14 = vpop.f32.mrb[32].mxu1 }
 0x4b6   : > { %v1474_v22 = vpop.f32.mrb[33].mxu1 }
 0x4b7   : > { %3332 = vmatprep.mubr.f32.mxu0 %v1474_v22 }
 0x4b8   : > { %3333 = vmatmul.mubr.f32.vlgmr.msra.gmra.mrb[48].mxu0 %v3278_v14 }
 0x4b9   : > { %v3281_v44 = vpop.f32.mrb[34].mxu1  ;;  %3853 = vmatpush3.bf16.msra.mxu0 %v4308_v51 }
 0x4ba   : > { %v1484_v3 = vpop.f32.mrb[35].mxu1  ;;  %3855 = vmatprep.subr.bf16.mxu0 %v4319_v57 }
 0x4bb   : > { %3335 = vmatprep.mubr.f32.mxu0 %v1484_v3 }
 0x4bc   : > { %3336 = vmatmul.mubr.f32.gmra.mrb[50].mxu0 %v3281_v44 }
 0x4bd   : > { %v3284_v8 = vpop.f32.mrb[36].mxu1  ;;  %3857 = vmatpush3.bf16.msra.mxu0 %v4319_v57 }
 0x4be   : > { %v1494_v10 = vpop.f32.mrb[37].mxu1  ;;  %3859 = vmatprep.subr.bf16.mxu0 %v4331_v62 }
 0x4bf   : > { %3338 = vmatprep.mubr.f32.mxu0 %v1494_v10 }
 0x4c0   : > { %3339 = vmatmul.mubr.f32.gmra.mrb[52].mxu0 %v3284_v8 }
 0x4c1   : > { %v3287_v23 = vpop.f32.mrb[38].mxu1  ;;  %3861 = vmatpush3.bf16.msra.mxu0 %v4331_v62 }
 0x4c2   : > { %v1504_v15 = vpop.f32.mrb[39].mxu1  ;;  %3863 = vmatprep.subr.bf16.mxu0 %v4350_v5 }
 0x4c3   : > { %3341 = vmatprep.mubr.f32.mxu0 %v1504_v15 }
 0x4c4   : > { %3342 = vmatmul.mubr.f32.gmra.mrb[54].mxu0 %v3287_v23 }
 0x4c5   : > { %v3290_v51 = vpop.f32.mrb[40].mxu1  ;;  %3865 = vmatpush3.bf16.msra.mxu0 %v4350_v5 }
 0x4c6   : > { %v1514_v61 = vpop.f32.mrb[41].mxu1  ;;  %3867 = vmatprep.subr.bf16.mxu0 %v4370_v12 }
 0x4c7   : > { %3344 = vmatprep.mubr.f32.mxu0 %v1514_v61 }
 0x4c8   : > { %3345 = vmatmul.mubr.f32.gmra.mrb[56].mxu0 %v3290_v51 }
 0x4c9   : > { %v3293_v57 = vpop.f32.mrb[42].mxu1  ;;  %3869 = vmatpush3.bf16.msra.mxu0 %v4370_v12 }
 0x4ca   : > { %v1524_v0 = vpop.f32.mrb[43].mxu1  ;;  %3871 = vmatprep.subr.bf16.mxu0 %v4390_v19 }
 0x4cb   : > { %3347 = vmatprep.mubr.f32.mxu0 %v1524_v0 }
 0x4cc   : > { %3348 = vmatmul.mubr.f32.gmra.mrb[58].mxu0 %v3293_v57 }
 0x4cd   : > { %v3296_v62 = vpop.f32.mrb[44].mxu1  ;;  %3873 = vmatpush3.bf16.msra.mxu0 %v4390_v19 }
 0x4ce   : > { %v1534_v21 = vpop.f32.mrb[45].mxu1  ;;  %3875 = vmatprep.subr.bf16.mxu0 %v4410_v27 }
 0x4cf   : > { %3350 = vmatprep.mubr.f32.mxu0 %v1534_v21 }
 0x4d0   : > { %3351 = vmatmul.mubr.f32.gmra.mrb[60].mxu0 %v3296_v62 }
 0x4d1   : > { %v3299_v5 = vpop.f32.mrb[46].mxu1  ;;  %3877 = vmatpush3.bf16.msra.mxu0 %v4410_v27 }
 0x4d2   : > { %v1544_v29 = vpop.f32.mrb[47].mxu1  ;;  %3879 = vmatprep.subr.bf16.mxu0 %v4430_v34 }
 0x4d3   : > { %3353 = vmatprep.mubr.f32.mxu0 %v1544_v29 }
 0x4d4   : > { %3354 = vmatmul.mubr.f32.gmra.mrb[62].mxu0 %v3299_v5 }
 0x4d5   : > { %3881 = vmatpush3.bf16.msra.mxu0 %v4430_v34 }
 0x58b   : > { %v3334_v12 = vpop.f32.mrb[48].mxu0 }
 0x58c   : > { %v1699_v30 = vadd.f32 %v3334_v12, %v4514_v25  ;;  %v1619_v32 = vpop.f32.mrb[49].mxu0 }
 0x58d   : > { %v1698_v19 = vadd.f32 %v1619_v32, %v4518_v26 }
 0x58e   : > { %v1715_v33 = vmax.f32 %v1699_v30, 0.0 }
 0x58f   : > { %v1714_v4 = vmax.f32 %v1698_v19, 0.0  ;;  %v3337_v7 = vpop.f32.mrb[50].mxu0 }
 0x590   : > { %v1701_v49 = vadd.f32 %v3337_v7, %v4524_v37  ;;  %v1629_v42 = vpop.f32.mrb[51].mxu0 }
 0x591   : > { %v3818_v27 = vpack.c.bf16 %v1715_v33, %v1714_v4  ;;  %v1700_v50 = vadd.f32 %v1629_v42, %v4528_v46 }
 0x592   : > { %v1717_v54 = vmax.f32 %v1701_v49, 0.0 }
 0x593   : > { %v1716_v55 = vmax.f32 %v1700_v50, 0.0  ;;  %v3340_v56 = vpop.f32.mrb[52].mxu0  ;;  %3819 = vmatprep.subr.bf16.mxu1 %v3818_v27 }
 0x594   : > { %v1703_v34 = vadd.f32 %v3340_v56, %v4534_v59  ;;  %v1639_v58 = vpop.f32.mrb[53].mxu0  ;;  %3821 = vmatpush3.bf16.msra.mxu1 %v3818_v27 }
 0x595   : > { %v3822_v11 = vpack.c.bf16 %v1717_v54, %v1716_v55  ;;  %v1702_v14 = vadd.f32 %v1639_v58, %v4538_v43 }
 0x596   : > { %v1719_v22 = vmax.f32 %v1703_v34, 0.0 }
 0x597   : > { %v1718_v44 = vmax.f32 %v1702_v14, 0.0  ;;  %v3343_v3 = vpop.f32.mrb[54].mxu0  ;;  %3823 = vmatprep.subr.bf16.mxu1 %v3822_v11 }
 0x598   : > { %v1705_v8 = vadd.f32 %v3343_v3, %v4544_v17  ;;  %v1649_v10 = vpop.f32.mrb[55].mxu0  ;;  %3825 = vmatpush3.bf16.msra.mxu1 %v3822_v11 }
 0x599   : > { %v3826_v23 = vpack.c.bf16 %v1719_v22, %v1718_v44  ;;  %v1704_v15 = vadd.f32 %v1649_v10, %v4548_v18 }
 0x59a   : > { %v1721_v51 = vmax.f32 %v1705_v8, 0.0 }
 0x59b   : > { %v1720_v61 = vmax.f32 %v1704_v15, 0.0  ;;  %v3346_v57 = vpop.f32.mrb[56].mxu0  ;;  %3827 = vmatprep.subr.bf16.mxu1 %v3826_v23 }
 0x59c   : > { %v1707_v0 = vadd.f32 %v3346_v57, %v4554_v45  ;;  %v1659_v62 = vpop.f32.mrb[57].mxu0  ;;  %3829 = vmatpush3.bf16.msra.mxu1 %v3826_v23  ;;  %v2161_v57 = vld [vmem:[%s4913_s10 + $0x48] sm:$0xff] }
 0x59d   : > { %v3830_v21 = vpack.c.bf16 %v1721_v51, %v1720_v61  ;;  %v1706_v5 = vadd.f32 %v1659_v62, %v4558_v41  ;;  %v2160_v61 = vld [vmem:[%s4913_s10 + $0x40] sm:$0xff] }
 0x59e   : > { %v1723_v29 = vmax.f32 %v1707_v0, 0.0 }
 0x59f   : > { %v1722_v12 = vmax.f32 %v1706_v5, 0.0  ;;  %v3349_v30 = vpop.f32.mrb[58].mxu0  ;;  %3831 = vmatprep.subr.bf16.mxu1 %v3830_v21  ;;  %v2162_v5 = vld [vmem:[%s4913_s10 + $0x50] sm:$0xff] }
 0x5a0   : > { %v1709_v32 = vadd.f32 %v3349_v30, %v4564_v60  ;;  %v1669_v19 = vpop.f32.mrb[59].mxu0  ;;  %3833 = vmatpush3.bf16.msra.mxu1 %v3830_v21  ;;  %v3930_v21 = vpack.c.bf16 %v2161_v57, %v2160_v61 }
 0x5a1   : > { %v3834_v33 = vpack.c.bf16 %v1723_v29, %v1722_v12  ;;  %v1708_v4 = vadd.f32 %v1669_v19, %v4568_v1  ;;  %v2163_v29 = vld [vmem:[%s4913_s10 + $0x58] sm:$0xff]  ;;  %v2164_v19 = vld [vmem:[%s4913_s10 + $0x60] sm:$0xff] }
 0x5a2   : > { %v1725_v7 = vmax.f32 %v1709_v32, 0.0  ;;  %v3934_v32 = vpack.c.bf16 %v2163_v29, %v2162_v5 }
 0x5a3   : > { %v1724_v49 = vmax.f32 %v1708_v4, 0.0  ;;  %v3352_v42 = vpop.f32.mrb[60].mxu0  ;;  %3835 = vmatprep.subr.bf16.mxu1 %v3834_v33 }
 0x5a4   : > { %v1711_v27 = vadd.f32 %v3352_v42, %v4574_v47  ;;  %v1679_v50 = vpop.f32.mrb[61].mxu0  ;;  %3837 = vmatpush3.bf16.msra.mxu1 %v3834_v33  ;;  %v2165_v33 = vld [vmem:[%s4913_s10 + $0x68] sm:$0xff] }
 0x5a5   : > { %v3838_v54 = vpack.c.bf16 %v1725_v7, %v1724_v49  ;;  %v1710_v55 = vadd.f32 %v1679_v50, %v4578_v48  ;;  %v3938_v49 = vpack.c.bf16 %v2165_v33, %v2164_v19 }
 0x5a6   : > { %v1727_v56 = vmax.f32 %v1711_v27, 0.0 }
 0x5a7   : > { %v1726_v34 = vmax.f32 %v1710_v55, 0.0  ;;  %v3355_v58 = vpop.f32.mrb[62].mxu0  ;;  %3839 = vmatprep.subr.bf16.mxu1 %v3838_v54  ;;  %v2166_v55 = vld [vmem:[%s4913_s10 + $0x70] sm:$0xff] }
 0x5a8   : > { %v1713_v11 = vadd.f32 %v3355_v58, %v4584_v52  ;;  %v1689_v14 = vpop.f32.mrb[63].mxu0  ;;  %3841 = vmatpush3.bf16.msra.mxu1 %v3838_v54  ;;  %v2054_v58 = vld [vmem:[%s4911_s8] sm:$0xff] }
 0x5a9   : > { %v3842_v22 = vpack.c.bf16 %v1727_v56, %v1726_v34  ;;  %v1712_v44 = vadd.f32 %v1689_v14, %v4588_v53  ;;  %v2167_v56 = vld [vmem:[%s4913_s10 + $0x78] sm:$0xff]  ;;  %v2056_v14 = vld [vmem:[%s4911_s8 + $0x10] sm:$0xff] }
 0x5aa   : > { %v1729_v3 = vmax.f32 %v1713_v11, 0.0  ;;  %v3942_v34 = vpack.c.bf16 %v2167_v56, %v2166_v55  ;;  %v2055_v11 = vld [vmem:[%s4911_s8 + $0x8] sm:$0xff] }
 0x5ab   : > { %v1728_v8 = vmax.f32 %v1712_v44, 0.0  ;;  %3843 = vmatprep.subr.bf16.mxu1 %v3842_v22  ;;  %v2057_v44 = vld [vmem:[%s4911_s8 + $0x18] sm:$0xff] }
 0x5ac   : > { %3845 = vmatpush3.bf16.msra.mxu1 %v3842_v22  ;;  %v3882_v22 = vpack.c.bf16 %v2055_v11, %v2054_v58 }
 0x5ad   : > { %v3846_v10 = vpack.c.bf16 %v1729_v3, %v1728_v8  ;;  %v3886_v3 = vpack.c.bf16 %v2057_v44, %v2056_v14  ;;  %v2058_v8 = vld [vmem:[%s4911_s8 + $0x20] sm:$0xff] }
 0x5af   : > { %3847 = vmatprep.subr.bf16.mxu1 %v3846_v10 }
 0x5b0   : > { %3849 = vmatpush3.bf16.msra.mxu1 %v3846_v10  ;;  %v2059_v10 = vld [vmem:[%s4911_s8 + $0x28] sm:$0xff] }
 0x5b1   : > { %3883 = vmatprep.subr.bf16.mxu1 %v3882_v22 }
 0x5b3   : > { %3389 = vmatmul.mubr.f32.vlgmr.msra.gmra.mrb[48].mxu1 %v4334_v63  ;;  %v2152_v63 = vld [vmem:[%s4913_s10] sm:$0xff] }
 0x5b4   : > { %3391 = vmatprep.mubr.f32.mxu1 %v4343_v2  ;;  %v2153_v2 = vld [vmem:[%s4913_s10 + $0x8] sm:$0xff]  ;;  %3885 = vmatpush3.bf16.msra.mxu1 %v3882_v22 }
 0x5b5   : > { %3887 = vmatprep.subr.bf16.mxu1 %v3886_v3 }
 0x5b7   : > { %3392 = vmatmul.mubr.f32.gmra.mrb[50].mxu1 %v4354_v6  ;;  %v3914_v6 = vpack.c.bf16 %v2153_v2, %v2152_v63  ;;  %v3890_v63 = vpack.c.bf16 %v2059_v10, %v2058_v8  ;;  %v2060_v2 = vld [vmem:[%s4911_s8 + $0x30] sm:$0xff] }
 0x5b8   : > { %3394 = vmatprep.mubr.f32.mxu1 %v4363_v9  ;;  %v2154_v9 = vld [vmem:[%s4913_s10 + $0x10] sm:$0xff]  ;;  %3889 = vmatpush3.bf16.msra.mxu1 %v3886_v3 }
 0x5b9   : > { %3915 = vmatprep.subr.bf16.mxu0 %v3914_v6  ;;  %3891 = vmatprep.subr.bf16.mxu1 %v3890_v63 }
 0x5bb   : > { %3395 = vmatmul.mubr.f32.gmra.mrb[52].mxu1 %v4374_v13  ;;  %v2155_v13 = vld [vmem:[%s4913_s10 + $0x18] sm:$0xff] }
 0x5bc   : > { %3397 = vmatprep.mubr.f32.mxu1 %v4383_v16  ;;  %3893 = vmatpush3.bf16.msra.mxu1 %v3890_v63 }
 0x5bf   : > { %3398 = vmatmul.mubr.f32.gmra.mrb[54].mxu1 %v4394_v20 }
 0x5c0   : > { %3400 = vmatprep.mubr.f32.mxu1 %v4403_v24  ;;  %v3918_v24 = vpack.c.bf16 %v2155_v13, %v2154_v9  ;;  %v2062_v13 = vld [vmem:[%s4911_s8 + $0x40] sm:$0xff] }
 0x5c3   : > { %3401 = vmatmul.mubr.f32.gmra.mrb[56].mxu1 %v4414_v28  ;;  %v2156_v28 = vld [vmem:[%s4913_s10 + $0x20] sm:$0xff] }
 0x5c4   : > { %3403 = vmatprep.mubr.f32.mxu1 %v4423_v31  ;;  %v2157_v31 = vld [vmem:[%s4913_s10 + $0x28] sm:$0xff] }
 0x5c7   : > { %3404 = vmatmul.mubr.f32.gmra.mrb[58].mxu1 %v4434_v35 }
 0x5c8   : > { %3406 = vmatprep.mubr.f32.mxu1 %v4437_v36 }
 0x5cb   : > { %3407 = vmatmul.mubr.f32.gmra.mrb[60].mxu1 %v4445_v38  ;;  %v3922_v38 = vpack.c.bf16 %v2157_v31, %v2156_v28  ;;  %v2065_v28 = vld [vmem:[%s4911_s8 + $0x58] sm:$0xff] }
 0x5cc   : > { %3409 = vmatprep.mubr.f32.mxu1 %v4448_v39  ;;  %v2158_v39 = vld [vmem:[%s4913_s10 + $0x30] sm:$0xff] }
 0x5cf   : > { %3410 = vmatmul.mubr.f32.gmra.mrb[62].mxu1 %v4455_v40  ;;  %v2159_v40 = vld [vmem:[%s4913_s10 + $0x38] sm:$0xff] }
 0x5d0   : > { %v3926_v51 = vpack.c.bf16 %v2159_v40, %v2158_v39 }
 0x686   : > { %v3390_v16 = vpop.f32.mrb[48].mxu1 }
 0x687   : > { %v1796_v20 = vpop.f32.mrb[49].mxu1 }
 0x688   : > { %3444 = vmatprep.mubr.f32.mxu0 %v1796_v20 }
 0x689   : > { %3445 = vmatmul.mubr.f32.vlgmr.msra.gmra.mrb[64].mxu0 %v3390_v16  ;;  %v2063_v16 = vld [vmem:[%s4911_s8 + $0x48] sm:$0xff] }
 0x68a   : > { %v3393_v35 = vpop.f32.mrb[50].mxu1  ;;  %3917 = vmatpush3.bf16.msra.mxu0 %v3914_v6  ;;  %v2061_v6 = vld [vmem:[%s4911_s8 + $0x38] sm:$0xff]  ;;  %v3898_v20 = vpack.c.bf16 %v2063_v16, %v2062_v13 }
 0x68b   : > { %v1806_v36 = vpop.f32.mrb[51].mxu1  ;;  %3919 = vmatprep.subr.bf16.mxu0 %v3918_v24  ;;  %v3894_v9 = vpack.c.bf16 %v2061_v6, %v2060_v2  ;;  %v2053_v2 = vld [vmem:[%s516_s1 + $0x8] sm:$0xff] }
 0x68c   : > { %3447 = vmatprep.mubr.f32.mxu0 %v1806_v36  ;;  %v2067_v36 = vld [vmem:[%s4911_s8 + $0x68] sm:$0xff] }
 0x68d   : > { %3448 = vmatmul.mubr.f32.gmra.mrb[66].mxu0 %v3393_v35  ;;  %3895 = vmatprep.subr.bf16.mxu1 %v3894_v9  ;;  %v2066_v35 = vld [vmem:[%s4911_s8 + $0x60] sm:$0xff] }
 0x68e   : > { %v3396_v23 = vpop.f32.mrb[52].mxu1  ;;  %3921 = vmatpush3.bf16.msra.mxu0 %v3918_v24  ;;  %v2064_v24 = vld [vmem:[%s4911_s8 + $0x50] sm:$0xff]  ;;  %3897 = vmatpush3.bf16.msra.mxu1 %v3894_v9  ;;  %v2595_v9 = vld [vmem:[%s4914_s11] ss:$0 sm:$0xff] }
 0x68f   : > { %v1816_v15 = vpop.f32.mrb[53].mxu1  ;;  %3923 = vmatprep.subr.bf16.mxu0 %v3922_v38  ;;  %3899 = vmatprep.subr.bf16.mxu1 %v3898_v20  ;;  %v3902_v31 = vpack.c.bf16 %v2065_v28, %v2064_v24 }
 0x690   : > { %3450 = vmatprep.mubr.f32.mxu0 %v1816_v15 }
 0x691   : > { %3451 = vmatmul.mubr.f32.gmra.mrb[68].mxu0 %v3396_v23 }
 0x692   : > { %v3399_v0 = vpop.f32.mrb[54].mxu1  ;;  %3925 = vmatpush3.bf16.msra.mxu0 %v3922_v38  ;;  %3901 = vmatpush3.bf16.msra.mxu1 %v3898_v20  ;;  %v3906_v38 = vpack.c.bf16 %v2067_v36, %v2066_v35 }
 0x693   : > { %v1826_v62 = vpop.f32.mrb[55].mxu1  ;;  %3927 = vmatprep.subr.bf16.mxu0 %v3926_v51  ;;  %3903 = vmatprep.subr.bf16.mxu1 %v3902_v31 }
 0x694   : > { %3453 = vmatprep.mubr.f32.mxu0 %v1826_v62 }
 0x695   : > { %3454 = vmatmul.mubr.f32.gmra.mrb[70].mxu0 %v3399_v0 }
 0x696   : > { %v3402_v12 = vpop.f32.mrb[56].mxu1  ;;  %3929 = vmatpush3.bf16.msra.mxu0 %v3926_v51  ;;  %3905 = vmatpush3.bf16.msra.mxu1 %v3902_v31 }
 0x697   : > { %v1836_v30 = vpop.f32.mrb[57].mxu1  ;;  %3931 = vmatprep.subr.bf16.mxu0 %v3930_v21  ;;  %3907 = vmatprep.subr.bf16.mxu1 %v3906_v38 }
 0x698   : > { %3456 = vmatprep.mubr.f32.mxu0 %v1836_v30 }
 0x699   : > { %3457 = vmatmul.mubr.f32.gmra.mrb[72].mxu0 %v3402_v12 }
 0x69a   : > { %v3405_v4 = vpop.f32.mrb[58].mxu1  ;;  %3933 = vmatpush3.bf16.msra.mxu0 %v3930_v21  ;;  %3909 = vmatpush3.bf16.msra.mxu1 %v3906_v38 }
 0x69b   : > { %v1846_v7 = vpop.f32.mrb[59].mxu1  ;;  %3935 = vmatprep.subr.bf16.mxu0 %v3934_v32 }
 0x69c   : > { %3459 = vmatprep.mubr.f32.mxu0 %v1846_v7 }
 0x69d   : > { %3460 = vmatmul.mubr.f32.gmra.mrb[74].mxu0 %v3405_v4 }
 0x69e   : > { %v3408_v42 = vpop.f32.mrb[60].mxu1  ;;  %3937 = vmatpush3.bf16.msra.mxu0 %v3934_v32 }
 0x69f   : > { %v1856_v27 = vpop.f32.mrb[61].mxu1  ;;  %3939 = vmatprep.subr.bf16.mxu0 %v3938_v49 }
 0x6a0   : > { %3462 = vmatprep.mubr.f32.mxu0 %v1856_v27 }
 0x6a1   : > { %3463 = vmatmul.mubr.f32.gmra.mrb[76].mxu0 %v3408_v42 }
 0x6a2   : > { %v3411_v50 = vpop.f32.mrb[62].mxu1  ;;  %3941 = vmatpush3.bf16.msra.mxu0 %v3938_v49 }
 0x6a3   : > { %v1866_v54 = vpop.f32.mrb[63].mxu1  ;;  %3943 = vmatprep.subr.bf16.mxu0 %v3942_v34 }
 0x6a4   : > { %3465 = vmatprep.mubr.f32.mxu0 %v1866_v54 }
 0x6a5   : > { %3466 = vmatmul.mubr.f32.gmra.mrb[78].mxu0 %v3411_v50 }
 0x6a6   : > { %3945 = vmatpush3.bf16.msra.mxu0 %v3942_v34 }
 0x75c   : > { %v3446_v39 = vpop.f32.mrb[64].mxu0 }
 0x75d   : > { %v2021_v40 = vadd.f32 %v3446_v39, %v4514_v25  ;;  %v1941_v23 = vpop.f32.mrb[65].mxu0 }
 0x75e   : > { %v2020_v15 = vadd.f32 %v1941_v23, %v4518_v26 }
 0x75f   : > { %v2037_v51 = vmax.f32 %v2021_v40, 0.0 }
 0x760   : > { %v2036_v61 = vmax.f32 %v2020_v15, 0.0  ;;  %v3449_v57 = vpop.f32.mrb[66].mxu0 }
 0x761   : > { %2404 = vst [vmem:[%s4797_s20 + $0x8] sm:$0xff] %v2037_v51  ;;  %v2023_v0 = vadd.f32 %v3449_v57, %v4524_v37  ;;  %v1951_v62 = vpop.f32.mrb[67].mxu0 }
 0x762   : > { %2403 = vst [vmem:[%s4797_s20] sm:$0xff] %v2036_v61  ;;  %v2022_v25 = vadd.f32 %v1951_v62, %v4528_v46  ;;  %3535 = vmatprep.mubr.f32.mxu0 %v2036_v61 }
 0x763   : > { %v2039_v21 = vmax.f32 %v2023_v0, 0.0  ;;  %3536 = vmatmul.mubr.f32.vlgmr.msra.gmra.mrb[80].mxu0 %v2037_v51 }
 0x764   : > { %v2038_v5 = vmax.f32 %v2022_v25, 0.0  ;;  %v3452_v29 = vpop.f32.mrb[68].mxu0 }
 0x765   : > { %2406 = vst [vmem:[%s4797_s20 + $0x18] sm:$0xff] %v2039_v21  ;;  %v2025_v26 = vadd.f32 %v3452_v29, %v4534_v59  ;;  %v1961_v12 = vpop.f32.mrb[69].mxu0 }
 0x766   : > { %2405 = vst [vmem:[%s4797_s20 + $0x10] sm:$0xff] %v2038_v5  ;;  %v2024_v30 = vadd.f32 %v1961_v12, %v4538_v43  ;;  %3538 = vmatprep.mubr.f32.mxu0 %v2038_v5 }
 0x767   : > { %v2041_v37 = vmax.f32 %v2025_v26, 0.0  ;;  %3539 = vmatmul.mubr.f32.gmra.mrb[82].mxu0 %v2039_v21 }
 0x768   : > { %v2040_v46 = vmax.f32 %v2024_v30, 0.0  ;;  %v3455_v32 = vpop.f32.mrb[70].mxu0 }
 0x769   : > { %2408 = vst [vmem:[%s4797_s20 + $0x28] sm:$0xff] %v2041_v37  ;;  %v2027_v19 = vadd.f32 %v3455_v32, %v4544_v17  ;;  %v1971_v33 = vpop.f32.mrb[71].mxu0 }
 0x76a   : > { %2407 = vst [vmem:[%s4797_s20 + $0x20] sm:$0xff] %v2040_v46  ;;  %v2026_v4 = vadd.f32 %v1971_v33, %v4548_v18  ;;  %3541 = vmatprep.mubr.f32.mxu0 %v2040_v46 }
 0x76b   : > { %v2043_v59 = vmax.f32 %v2027_v19, 0.0  ;;  %3542 = vmatmul.mubr.f32.gmra.mrb[84].mxu0 %v2041_v37 }
 0x76c   : > { %v2042_v43 = vmax.f32 %v2026_v4, 0.0  ;;  %v3458_v7 = vpop.f32.mrb[72].mxu0 }
 0x76d   : > { %2410 = vst [vmem:[%s4797_s20 + $0x38] sm:$0xff] %v2043_v59  ;;  %v2029_v49 = vadd.f32 %v3458_v7, %v4554_v45  ;;  %v1981_v42 = vpop.f32.mrb[73].mxu0 }
 0x76e   : > { %2409 = vst [vmem:[%s4797_s20 + $0x30] sm:$0xff] %v2042_v43  ;;  %v2028_v27 = vadd.f32 %v1981_v42, %v4558_v41  ;;  %3544 = vmatprep.mubr.f32.mxu0 %v2042_v43 }
 0x76f   : > { %v2045_v17 = vmax.f32 %v2029_v49, 0.0  ;;  %3545 = vmatmul.mubr.f32.gmra.mrb[86].mxu0 %v2043_v59 }
 0x770   : > { %v2044_v18 = vmax.f32 %v2028_v27, 0.0  ;;  %v3461_v50 = vpop.f32.mrb[74].mxu0 }
 0x771   : > { %2412 = vst [vmem:[%s4797_s20 + $0x48] sm:$0xff] %v2045_v17  ;;  %v2031_v54 = vadd.f32 %v3461_v50, %v4564_v60  ;;  %v1991_v55 = vpop.f32.mrb[75].mxu0 }
 0x772   : > { %2411 = vst [vmem:[%s4797_s20 + $0x40] sm:$0xff] %v2044_v18  ;;  %v2030_v56 = vadd.f32 %v1991_v55, %v4568_v1  ;;  %3547 = vmatprep.mubr.f32.mxu0 %v2044_v18  ;;  %v2594_v55 = vld [vmem:[%s4912_s9] ss:$0 sm:$0xff] }
 0x773   : > { %v2047_v45 = vmax.f32 %v2031_v54, 0.0  ;;  %3548 = vmatmul.mubr.f32.gmra.mrb[88].mxu0 %v2045_v17 }
 0x774   : > { %v2046_v41 = vmax.f32 %v2030_v56, 0.0  ;;  %v3464_v34 = vpop.f32.mrb[76].mxu0 }
 0x775   : > { %2414 = vst [vmem:[%s4797_s20 + $0x58] sm:$0xff] %v2047_v45  ;;  %v2033_v58 = vadd.f32 %v3464_v34, %v4574_v47  ;;  %v2001_v11 = vpop.f32.mrb[77].mxu0 }
 0x776   : > { %2413 = vst [vmem:[%s4797_s20 + $0x50] sm:$0xff] %v2046_v41  ;;  %v2032_v14 = vadd.f32 %v2001_v11, %v4578_v48  ;;  %3550 = vmatprep.mubr.f32.mxu0 %v2046_v41  ;;  %v2068_v48 = vld [vmem:[%s4911_s8 + $0x70] sm:$0xff] }
 0x777   : > { %v2049_v60 = vmax.f32 %v2033_v58, 0.0  ;;  %3551 = vmatmul.mubr.f32.gmra.mrb[90].mxu0 %v2047_v45 }
 0x778   : > { %v2048_v1 = vmax.f32 %v2032_v14, 0.0  ;;  %v3467_v22 = vpop.f32.mrb[78].mxu0 }
 0x779   : > { %2416 = vst [vmem:[%s4797_s20 + $0x68] sm:$0xff] %v2049_v60  ;;  %v2035_v44 = vadd.f32 %v3467_v22, %v4584_v52  ;;  %v2011_v3 = vpop.f32.mrb[79].mxu0  ;;  %v2069_v52 = vld [vmem:[%s4911_s8 + $0x78] sm:$0xff] }
 0x77a   : > { %2415 = vst [vmem:[%s4797_s20 + $0x60] sm:$0xff] %v2048_v1  ;;  %v2034_v8 = vadd.f32 %v2011_v3, %v4588_v53  ;;  %3553 = vmatprep.mubr.f32.mxu0 %v2048_v1  ;;  %v3910_v63 = vpack.c.bf16 %v2069_v52, %v2068_v48  ;;  %v2052_v53 = vld [vmem:[%s516_s1] sm:$0xff]  ;;  %s2607_s1 = sshll.u32 %s4181_s29, 8  ;;  %s4023_s29 = scalar_lea.vmem %s4855_s24, 256 }
 0x77b   : > { %v2051_v47 = vmax.f32 %v2035_v44, 0.0  ;;  %3554 = vmatmul.mubr.f32.gmra.mrb[92].mxu0 %v2049_v60  ;;  %3500 = vmatprep.mubr.f32.mxu1 %v2052_v53  ;;  %p4024_p11 = scmp.ne.s32.totalorder %s4855_s24, %s4023_s29  ;;  %p4031_p1 = scmp.lt.s32.totalorder %s4029_s30, %s4023_s29 }
 0x77c   : > { %v2050_v10 = vmax.f32 %v2034_v8, 0.0  ;;  %3911 = vmatprep.subr.bf16.mxu1 %v3910_v63 }
 0x77d   : > { %2418 = vst [vmem:[%s4797_s20 + $0x78] sm:$0xff] %v2051_v47  ;;  %3913 = vmatpush3.bf16.msra.mxu1 %v3910_v63  ;;  %p4025_p12 = pnand %p4024_p11, %p4198_p5  ;;  %p4032_p2 = por %p4031_p1, %p4030_p0 }
 0x77e   : > { %2417 = vst [vmem:[%s4797_s20 + $0x70] sm:$0xff] %v2050_v10  ;;  %3556 = vmatprep.mubr.f32.mxu0 %v2050_v10  ;;  %s4843_s20 = scalar_lea.vmem %s4907_s4, %s2603_s27 }
 0x77f   : > { %3557 = vmatmul.mubr.f32.gmra.mrb[94].mxu0 %v2051_v47  ;;  %v2320_v6 = vld [vmem:[%s4843_s20] sm:$0xff]  ;;  %v2321_v54 = vld [vmem:[%s4843_s20 + $0x8] sm:$0xff]  ;;  %s4860_s20 = scalar_lea.hbm %s4915_s12, %s2607_s1  ;;  %p4026_p13 = pneg %p4025_p12 }
 0x780   : > { %3501 = vmatmul.mubr.f32.vlgmr.msra.gmra.mrb[64].mxu1 %v2053_v2 }
 0x781   : > { %3591 = vmatprep.mubr.f32.mxu1 %v2320_v6  ;;  %p4033_p3 = pnand %p4032_p2, %p4026_p13 }
 0x836   : > { %v3537_v13 = vpop.f32.mrb[80].mxu0 }
 0x837   : > { %v2247_v16 = vadd.f32 %v3537_v13, %v2595_v9  ;;  %v2241_v20 = vpop.f32.mrb[81].mxu0 }
 0x838   : > { %v2242_v24 = vadd.f32 %v2595_v9, %v2241_v20 }
 0x83a   : > { %v3946_v28 = vpack.c.bf16 %v2247_v16, %v2242_v24  ;;  %v3540_v31 = vpop.f32.mrb[82].mxu0 }
 0x83b   : > { %v2257_v35 = vadd.f32 %v3540_v31, %v2595_v9  ;;  %v2251_v36 = vpop.f32.mrb[83].mxu0 }
 0x83c   : > { %v2252_v38 = vadd.f32 %v2595_v9, %v2251_v36  ;;  %3947 = vmatprep.subr.bf16.mxu1 %v3946_v28 }
 0x83d   : > { %3949 = vmatpush3.bf16.msra.mxu1 %v3946_v28 }
 0x83e   : > { %v3950_v39 = vpack.c.bf16 %v2257_v35, %v2252_v38  ;;  %v3543_v40 = vpop.f32.mrb[84].mxu0 }
 0x83f   : > { %v2267_v23 = vadd.f32 %v3543_v40, %v2595_v9  ;;  %v2261_v15 = vpop.f32.mrb[85].mxu0 }
 0x840   : > { %v2262_v51 = vadd.f32 %v2595_v9, %v2261_v15  ;;  %3951 = vmatprep.subr.bf16.mxu1 %v3950_v39 }
 0x841   : > { %3953 = vmatpush3.bf16.msra.mxu1 %v3950_v39 }
 0x842   : > { %v3954_v61 = vpack.c.bf16 %v2267_v23, %v2262_v51  ;;  %v3546_v57 = vpop.f32.mrb[86].mxu0 }
 0x843   : > { %v2277_v0 = vadd.f32 %v3546_v57, %v2595_v9  ;;  %v2271_v62 = vpop.f32.mrb[87].mxu0 }
 0x844   : > { %v2272_v25 = vadd.f32 %v2595_v9, %v2271_v62  ;;  %3955 = vmatprep.subr.bf16.mxu1 %v3954_v61 }
 0x845   : > { %3957 = vmatpush3.bf16.msra.mxu1 %v3954_v61 }
 0x846   : > { %v3958_v21 = vpack.c.bf16 %v2277_v0, %v2272_v25  ;;  %v3549_v5 = vpop.f32.mrb[88].mxu0 }
 0x847   : > { %v2287_v29 = vadd.f32 %v3549_v5, %v2595_v9  ;;  %v2281_v26 = vpop.f32.mrb[89].mxu0 }
 0x848   : > { %v2282_v12 = vadd.f32 %v2595_v9, %v2281_v26  ;;  %3959 = vmatprep.subr.bf16.mxu1 %v3958_v21 }
 0x849   : > { %3961 = vmatpush3.bf16.msra.mxu1 %v3958_v21 }
 0x84a   : > { %v3962_v30 = vpack.c.bf16 %v2287_v29, %v2282_v12  ;;  %v3552_v37 = vpop.f32.mrb[90].mxu0 }
 0x84b   : > { %v2297_v46 = vadd.f32 %v3552_v37, %v2595_v9  ;;  %v2291_v32 = vpop.f32.mrb[91].mxu0 }
 0x84c   : > { %v2292_v19 = vadd.f32 %v2595_v9, %v2291_v32  ;;  %3963 = vmatprep.subr.bf16.mxu1 %v3962_v30 }
 0x84d   : > { %3965 = vmatpush3.bf16.msra.mxu1 %v3962_v30 }
 0x84e   : > { %v3966_v33 = vpack.c.bf16 %v2297_v46, %v2292_v19  ;;  %v3555_v4 = vpop.f32.mrb[92].mxu0 }
 0x84f   : > { %v2307_v59 = vadd.f32 %v3555_v4, %v2595_v9  ;;  %v2301_v43 = vpop.f32.mrb[93].mxu0 }
 0x850   : > { %v2302_v7 = vadd.f32 %v2595_v9, %v2301_v43  ;;  %3967 = vmatprep.subr.bf16.mxu1 %v3966_v33 }
 0x851   : > { %3969 = vmatpush3.bf16.msra.mxu1 %v3966_v33 }
 0x852   : > { %v3970_v49 = vpack.c.bf16 %v2307_v59, %v2302_v7  ;;  %v3558_v42 = vpop.f32.mrb[94].mxu0 }
 0x853   : > { %v2317_v27 = vadd.f32 %v3558_v42, %v2595_v9  ;;  %v2311_v17 = vpop.f32.mrb[95].mxu0 }
 0x854   : > { %v2312_v18 = vadd.f32 %v2595_v9, %v2311_v17  ;;  %3971 = vmatprep.subr.bf16.mxu1 %v3970_v49 }
 0x855   : > { %3973 = vmatpush3.bf16.msra.mxu1 %v3970_v49 }
 0x856   : > { %v3974_v50 = vpack.c.bf16 %v2317_v27, %v2312_v18 }
 0x858   : > { %3975 = vmatprep.subr.bf16.mxu1 %v3974_v50 }
 0x859   : > { %3977 = vmatpush3.bf16.msra.mxu1 %v3974_v50 }
 0x85c   : > { %3592 = vmatmul.mubr.f32.vlgmr.msra.gmra.mrb[64].mxu1 %v2321_v54 }
 0x92f   : > { %v3593_v56 = vpop.f32.mrb[64].mxu1 }
 0x930   : > { %v3978_v45 = vadd.f32 %v3593_v56, %v2594_v55  ;;  %v2388_v41 = vpop.f32.mrb[65].mxu1 }
 0x931   : > { %v3979_v34 = vadd.f32 %v2594_v55, %v2388_v41 }
 0x932   : > { %v2400_v58 = vmax.f32 %v3978_v45, 0.0 }
 0x933   : > { %v2399_v11 = vmax.f32 %v3979_v34, 0.0 }
 0x934   : > { %2402 = vst [vmem:[%s494_s22 + $0x8] sm:$0xff] %v2400_v58 }
 0x935   : > { %2401 = vst [vmem:[%s494_s22] sm:$0xff] %v2399_v11 }
 0x936   : > { %4036 = shalt.err (!%p4033_p3)
}
 0x937   : > { %s4037_s17 = scalar_lea.hbm %s4860_s20, 256  ;;  %s4041_s1 = scalar_lea.hbm %s4915_s12, 512 }
 0x938   : > { %p4038_p4 = scmp.ne.s32.totalorder %s4860_s20, %s4037_s17  ;;  %p4042_p9 = scmp.lt.u32.totalorder %s4860_s20, %s4915_s12 }
 0x939   : > { %p4043_p10 = scmp.lt.u32.totalorder %s4041_s1, %s4037_s17  ;;  %p4045_p12 = scmp.lt.u32.totalorder %s4037_s17, %s4860_s20 }
 0x93a   : > { %p4039_p7 = pnand %p4038_p4, %p4198_p5 }
 0x93b   : > { %p4044_p11 = por %p4043_p10, %p4042_p9 }
 0x93c   : > { %p4040_p8 = pneg %p4039_p7 }
 0x93d   : > { %p4046_p13 = por %p4045_p12, %p4044_p11 }
 0x93f   : > { %p4047_p0 = pnand %p4046_p13, %p4040_p8 }
 0x941   : > { %4050 = shalt.err (!%p4047_p0)
}
 0x942   : > { %s4088_s29 = smov 128   ;;  %s4089_s21 = smov 8  }
 0x943   : > { %3982 = dma.vmem_to_hbm [thread:$0]  (%p4198_p5), %s4855_s24, 256, %s4860_s20, %s4862_s23, %s4088_s29, %s4088_s29, %s4089_s21  }
 0x944 PF: > { %p3988_p1 = scmp.ge.s32.totalorder %s4085_s28, 2  ;;  %s2456_s0 = sand.u32 1, %s4073_s25  }
 0x945   : > { %s2457_s30 = scalar_lea.sflag [#allocation3], %s2456_s0 }
 0x946   : > { %p3985_p2 = pnand %p3988_p1, %p4202_p6 }
 0x948   : > { %4068 = dma.done.wait (!%p3985_p2), %s2457_s30, 256  }
 0x949   : > { %4070 = vsyncadd (!%p3985_p2), %s2457_s30, 4294967040  ;;  %s4926_s17 = sld [smem:[#allocation5_spill]]  ;;  %s4927_s27 = sld [smem:[#allocation6_spill]] }
 0x94a   : > { %p24_p3 = scmp.ge.s32.totalorder %s4185_s14, 4   ;;  %s4928_s25 = smov %s4077_s26 }
 0x94b   : > { %s4930_s28 = smov %s4185_s14 }
 0x94c   :  { %26 = sbr.rel (!%p24_p3) target bundleno = 6 (0x6), region = 127 }
 0x94f   : > { %s4929_s26 = smov %s4926_s17 }
 0x953   :  { %2470 = vsyncpa [#allocation3], 1 }
 0x954   :  { %2472 = vsyncpa [#allocation3 + $0x1], 1 }

</bundles_post_ra>
